<compile_context>
chip_gen: v5e
topology: v5e:2x2
jax: 0.10.0
libtpu: 0.0.40
codegen_flags: <defaults>
</compile_context>

<pallas_src>
import numpy as np
import jax
import jax.numpy as jnp
from jax.experimental import pallas as pl
from jax.experimental.pallas import tpu as pltpu

IN_DIM = 32     # word_dim (small demo size)
MEM_DIM = 128   # mem_dim (real model uses 1024; also a multiple of 128)
LANE = 128
SUBLANE = 8


# ----------------------------------------------------------------------------
# Pallas kernel: one grid step = one whole tree level (deepest level first).
# The node-state tables c_ref/h_ref are constant-index-map outputs, i.e. they
# stay resident in VMEM across all grid steps and act as the persistent state.
# ----------------------------------------------------------------------------
def tree_level_kernel(x_ref, sel_ref, wx_ref, bx_ref, wiouh_ref, wfh_ref,
                      c_ref, h_ref):
    # x_ref   : (1, b_pad, in_pad)            f32   this level's node inputs
    # sel_ref : (1, k_max, b_pad, rows)       f32   one-hot child selection
    # wx_ref  : (in_pad, 4*mem)               bf16  [W_ioux | W_fx]
    # bx_ref  : (1, 4*mem)                    f32   [b_ioux+b_iouh | b_fx+b_fh]
    # wiouh   : (mem, 3*mem) bf16,  wfh: (mem, mem) bf16
    # c_ref/h_ref : (num_levels, b_pad, mem)  f32   whole state table (VMEM)
    mem = wfh_ref.shape[0]
    num_levels, b_pad, _ = c_ref.shape
    k_max = sel_ref.shape[1]
    rows = num_levels * b_pad
    l = pl.program_id(0)

    @pl.when(l == 0)
    def _init():
        c_ref[...] = jnp.zeros_like(c_ref)
        h_ref[...] = jnp.zeros_like(h_ref)

    # Fused x-path: one lane-dense (b_pad, 4*mem) MXU result, biases folded.
    x = x_ref[0].astype(jnp.bfloat16)
    xz = jnp.dot(x, wx_ref[...], preferred_element_type=jnp.float32) + bx_ref[...]
    fx = xz[:, 3 * mem:4 * mem]                              # (b_pad, mem)

    # Full state table as a 2D slab (tile-preserving reshape: b_pad % 8 == 0).
    tab_c = c_ref[...].reshape(rows, mem)
    tab_h = h_ref[...].reshape(rows, mem)

    # Per-child-slot gather via one-hot selection matmul (MXU), then ChildSum
    # and forget-gate accumulation.  Missing children have all-zero rows.
    h_sum = jnp.zeros((b_pad, mem), jnp.float32)
    fc_sum = jnp.zeros((b_pad, mem), jnp.float32)
    for k in range(k_max):                                   # small static unroll
        sk = sel_ref[0, k]                                   # (b_pad, rows)
        ch_h = jnp.dot(sk, tab_h, preferred_element_type=jnp.float32)
        ch_c = jnp.dot(sk, tab_c, preferred_element_type=jnp.float32)
        h_sum = h_sum + ch_h
        f = jax.nn.sigmoid(
            jnp.dot(ch_h.astype(jnp.bfloat16), wfh_ref[...],
                    preferred_element_type=jnp.float32) + fx)
        fc_sum = fc_sum + f * ch_c

    iou = xz[:, 0:3 * mem] + jnp.dot(
        h_sum.astype(jnp.bfloat16), wiouh_ref[...],
        preferred_element_type=jnp.float32)
    i_g = jax.nn.sigmoid(iou[:, 0:mem])
    o_g = jax.nn.sigmoid(iou[:, mem:2 * mem])
    u_g = jnp.tanh(iou[:, 2 * mem:3 * mem])

    c = i_g * u_g + fc_sum
    h = o_g * jnp.tanh(c)

    # Scatter this level's results back into the resident table (level l owns
    # rows [l*b_pad, (l+1)*b_pad)).  Padded slots write rows nobody reads.
    c_ref[l] = c
    h_ref[l] = h


# ----------------------------------------------------------------------------
# Single jit / single pallas_call over all levels.
# ----------------------------------------------------------------------------
@jax.jit
def tree_lstm_forward(x_levels, sel, wx, bx, wiouh, wfh):
    num_levels, b_pad, in_pad = x_levels.shape
    k_max, rows = sel.shape[1], sel.shape[3]
    mem = wfh.shape[0]
    out_shape = (jax.ShapeDtypeStruct((num_levels, b_pad, mem), jnp.float32),
                 jax.ShapeDtypeStruct((num_levels, b_pad, mem), jnp.float32))
    c_all, h_all = pl.pallas_call(
        tree_level_kernel,
        out_shape=out_shape,
        grid=(num_levels,),
        in_specs=[
            pl.BlockSpec((1, b_pad, in_pad), lambda l: (l, 0, 0)),
            pl.BlockSpec((1, k_max, b_pad, rows), lambda l: (l, 0, 0, 0)),
            # Weights/bias: constant index maps -> stay VMEM-resident.
            pl.BlockSpec((in_pad, 4 * mem), lambda l: (0, 0)),
            pl.BlockSpec((1, 4 * mem), lambda l: (0, 0)),
            pl.BlockSpec((mem, 3 * mem), lambda l: (0, 0)),
            pl.BlockSpec((mem, mem), lambda l: (0, 0)),
        ],
        out_specs=(
            pl.BlockSpec((num_levels, b_pad, mem), lambda l: (0, 0, 0)),
            pl.BlockSpec((num_levels, b_pad, mem), lambda l: (0, 0, 0)),
        ),
        compiler_params=pltpu.CompilerParams(
            dimension_semantics=("arbitrary",),        # levels are sequential
            vmem_limit_bytes=64 * 1024 * 1024),
    )(x_levels, sel, wx, bx, wiouh, wfh)
    return c_all, h_all


# ----------------------------------------------------------------------------
# Tree plumbing (host side, runs once): group nodes by depth, pad every level
# to a common (b_pad, k_max), build one-hot child-selection tensors.
# ----------------------------------------------------------------------------
class Tree:
    def __init__(self, value, children=()):
        self.value = value                    # (1, in_dim)
        self.children = list(children)
        self.num_children = len(self.children)


def build_level_inputs(root, in_dim, in_pad, b_mult=SUBLANE):
    levels = []

    def visit(node, depth):
        if depth == len(levels):
            levels.append([])
        levels[depth].append(node)
        for ch in node.children:
            visit(ch, depth + 1)

    visit(root, 0)
    levels = levels[::-1]                     # deepest level first
    num_levels = len(levels)
    b_pad = max(len(lv) for lv in levels)
    b_pad = ((b_pad + b_mult - 1) // b_mult) * b_mult
    k_max = max(1, max(n.num_children for lv in levels for n in lv))
    rows = num_levels * b_pad

    for l, lv in enumerate(levels):
        for j, n in enumerate(lv):
            n.row = l * b_pad + j

    x = np.zeros((num_levels, b_pad, in_pad), np.float32)
    sel = np.zeros((num_levels, k_max, b_pad, rows), np.float32)
    for l, lv in enumerate(levels):
        for j, n in enumerate(lv):
            x[l, j, :in_dim] = np.asarray(n.value).reshape(in_dim)
            for k, ch in enumerate(n.children):
                sel[l, k, j, ch.row] = 1.0
    return levels, jnp.asarray(x), jnp.asarray(sel)


def tree_forward(root, packed, in_dim, in_pad):
    levels, x_levels, sel = build_level_inputs(root, in_dim, in_pad)
    c_all, h_all = tree_lstm_forward(x_levels, sel, packed["wx"], packed["bx"],
                                     packed["wiouh"], packed["wfh"])
    mem = c_all.shape[-1]
    c_tab = c_all.reshape(-1, mem)
    h_tab = h_all.reshape(-1, mem)
    root_row = levels[-1][0].row                       # root is the last level
    c_root = c_tab[root_row][None, :]
    h_root = h_tab[root_row][None, :]
    return (c_root, h_root), c_tab, h_tab, levels


# ----------------------------------------------------------------------------
# Parameters (same shapes as the nn.Linear layers, stored as (in, out)), plus
# fused/bf16 packing for the kernel.
# ----------------------------------------------------------------------------
def init_params(key, in_dim, mem_dim):
    ks = jax.random.split(key, 8)

    def lin(kw, kb, fan_in, fan_out):
        bound = 1.0 / np.sqrt(fan_in)
        w = jax.random.uniform(kw, (fan_in, fan_out), jnp.float32, -bound, bound)
        b = jax.random.uniform(kb, (1, fan_out), jnp.float32, -bound, bound)
        return w, b

    wioux, bioux = lin(ks[0], ks[1], in_dim, 3 * mem_dim)
    wiouh, biouh = lin(ks[2], ks[3], mem_dim, 3 * mem_dim)
    wfx, bfx = lin(ks[4], ks[5], in_dim, mem_dim)
    wfh, bfh = lin(ks[6], ks[7], mem_dim, mem_dim)
    return dict(wioux=wioux, bioux=bioux, wiouh=wiouh, biouh=biouh,
                wfx=wfx, bfx=bfx, wfh=wfh, bfh=bfh)


def pack_params(p, in_dim, in_pad):
    # x-path fusion [W_ioux | W_fx] zero-padded to in_pad contraction rows;
    # biases folded: [b_ioux+b_iouh | b_fx+b_fh].  Weights in bf16 (MXU feed).
    wx = jnp.concatenate([p["wioux"], p["wfx"]], axis=1)
    wx = jnp.pad(wx, ((0, in_pad - in_dim), (0, 0)))
    bx = jnp.concatenate([p["bioux"] + p["biouh"], p["bfx"] + p["bfh"]], axis=1)
    return dict(wx=wx.astype(jnp.bfloat16), bx=bx,
                wiouh=p["wiouh"].astype(jnp.bfloat16),
                wfh=p["wfh"].astype(jnp.bfloat16))


# ----------------------------------------------------------------------------
# Pure-JAX reference (mirrors the PyTorch node_forward) for validation.
# ----------------------------------------------------------------------------
def node_forward_ref(x, child_c, child_h, p):
    m = p["wfh"].shape[0]
    child_h_sum = jnp.sum(child_h, axis=0, keepdims=True)
    iou = x @ p["wioux"] + p["bioux"] + child_h_sum @ p["wiouh"] + p["biouh"]
    i = jax.nn.sigmoid(iou[:, 0:m])
    o = jax.nn.sigmoid(iou[:, m:2 * m])
    u = jnp.tanh(iou[:, 2 * m:3 * m])
    f = jax.nn.sigmoid(child_h @ p["wfh"] + p["bfh"] + (x @ p["wfx"] + p["bfx"]))
    c = i * u + jnp.sum(f * child_c, axis=0, keepdims=True)
    h = o * jnp.tanh(c)
    return c, h


if __name__ == "__main__":
    key = jax.random.PRNGKey(0)
    pkey, vkey = jax.random.split(key)
    in_pad = ((IN_DIM + LANE - 1) // LANE) * LANE
    params = init_params(pkey, IN_DIM, MEM_DIM)
    packed = pack_params(params, IN_DIM, in_pad)

    # Deterministic 3-level tree: root -> 4 internal nodes -> [3,2,4,1] leaves.
    child_counts = [3, 2, 4, 1]
    total = 1 + len(child_counts) + sum(child_counts)
    vals = np.asarray(jax.random.normal(vkey, (total, 1, IN_DIM), jnp.float32))
    vi = iter(range(total))
    internals = []
    for nc in child_counts:
        leaves = [Tree(vals[next(vi)]) for _ in range(nc)]
        internals.append(Tree(vals[next(vi)], leaves))
    root = Tree(vals[next(vi)], internals)

    (c_root, h_root), c_tab, h_tab, levels = tree_forward(
        root, packed, IN_DIM, in_pad)
    jax.block_until_ready((c_tab, h_tab))

    # Validate every node against a pure-JAX recursive reference (f32 weights;
    # kernel uses bf16 weights -> loosened tolerance).
    def ref_tree(node):
        if node.num_children == 0:
            cc = jnp.zeros((1, MEM_DIM), jnp.float32)
            ch = jnp.zeros((1, MEM_DIM), jnp.float32)
        else:
            states = [ref_tree(x) for x in node.children]
            cc = jnp.concatenate([s[0] for s in states], axis=0)
            ch = jnp.concatenate([s[1] for s in states], axis=0)
        node.ref_state = node_forward_ref(jnp.asarray(node.value), cc, ch, params)
        return node.ref_state

    ref_tree(root)
    max_err = 0.0
    for lv in levels:
        for n in lv:
            c_ref, h_ref = n.ref_state
            max_err = max(max_err,
                          float(jnp.max(jnp.abs(c_tab[n.row] - c_ref[0]))),
                          float(jnp.max(jnp.abs(h_tab[n.row] - h_ref[0]))))
    assert max_err < 5e-2, f"node state mismatch, max abs err {max_err}"
    assert float(jnp.max(jnp.abs(c_root - root.ref_state[0]))) < 5e-2
    assert float(jnp.max(jnp.abs(h_root - root.ref_state[1]))) < 5e-2

    print("KERNEL_OK")
</pallas_src>

<mosaic_0001>
module attributes {stable_mosaic.version = 11 : i64} {
  func.func @tree_level_kernel(%arg0: i32, %arg1: memref<1x16x128xf32, #tpu.memory_space<vmem>>, %arg2: memref<1x4x16x48xf32, #tpu.memory_space<vmem>>, %arg3: memref<128x512xbf16, #tpu.memory_space<vmem>>, %arg4: memref<1x512xf32, #tpu.memory_space<vmem>>, %arg5: memref<128x384xbf16, #tpu.memory_space<vmem>>, %arg6: memref<128x128xbf16, #tpu.memory_space<vmem>>, %arg7: memref<3x16x128xf32, #tpu.memory_space<vmem>>, %arg8: memref<3x16x128xf32, #tpu.memory_space<vmem>>) attributes {dimension_semantics = [#tpu.dimension_semantics<arbitrary>], iteration_bounds = array<i64: 3>, scalar_prefetch = 0 : i64, scratch_operands = 0 : i64, tpu.core_type = #tpu.core_type<tc>, window_params = [{transform_indices = @transform_0, window_bounds = array<i64: 1, 16, 128>}, {transform_indices = @transform_1, window_bounds = array<i64: 1, 4, 16, 48>}, {pipeline_mode = #tpu.pipeline_mode<synchronous>, transform_indices = @transform_2, window_bounds = array<i64: 128, 512>}, {pipeline_mode = #tpu.pipeline_mode<synchronous>, transform_indices = @transform_3, window_bounds = array<i64: 1, 512>}, {pipeline_mode = #tpu.pipeline_mode<synchronous>, transform_indices = @transform_4, window_bounds = array<i64: 128, 384>}, {pipeline_mode = #tpu.pipeline_mode<synchronous>, transform_indices = @transform_5, window_bounds = array<i64: 128, 128>}, {pipeline_mode = #tpu.pipeline_mode<synchronous>, transform_indices = @transform_6, window_bounds = array<i64: 3, 16, 128>}, {pipeline_mode = #tpu.pipeline_mode<synchronous>, transform_indices = @transform_7, window_bounds = array<i64: 3, 16, 128>}]} {
    %c0_i32 = arith.constant 0 : i32
    %0 = arith.cmpi eq, %arg0, %c0_i32 : i32
    %1 = arith.extui %0 : i1 to i32
    %c0_i32_0 = arith.constant 0 : i32
    %2 = arith.cmpi ne, %1, %c0_i32_0 : i32
    scf.if %2 {
      %cst_61 = arith.constant 0.000000e+00 : f32
      %113 = vector.broadcast %cst_61 : f32 to vector<3x16x128xf32>
      %c0_62 = arith.constant 0 : index
      %c0_63 = arith.constant 0 : index
      %c0_64 = arith.constant 0 : index
      %114 = vector.load %arg7[%c0_62, %c0_63, %c0_64] : memref<3x16x128xf32, #tpu.memory_space<vmem>>, vector<3x16x128xf32>
      tpu.vector_store %arg7[%c0_62, %c0_63, %c0_64], %113 {strides = array<i32>} : memref<3x16x128xf32, #tpu.memory_space<vmem>>, vector<3x16x128xf32>,
      %cst_65 = arith.constant 0.000000e+00 : f32
      %115 = vector.broadcast %cst_65 : f32 to vector<3x16x128xf32>
      %c0_66 = arith.constant 0 : index
      %c0_67 = arith.constant 0 : index
      %c0_68 = arith.constant 0 : index
      %116 = vector.load %arg8[%c0_66, %c0_67, %c0_68] : memref<3x16x128xf32, #tpu.memory_space<vmem>>, vector<3x16x128xf32>
      tpu.vector_store %arg8[%c0_66, %c0_67, %c0_68], %115 {strides = array<i32>} : memref<3x16x128xf32, #tpu.memory_space<vmem>>, vector<3x16x128xf32>,
    } else {
    }
    %c0 = arith.constant 0 : index
    %c0_1 = arith.constant 0 : index
    %c0_2 = arith.constant 0 : index
    %3 = vector.load %arg1[%c0, %c0_1, %c0_2] : memref<1x16x128xf32, #tpu.memory_space<vmem>>, vector<1x16x128xf32>
    %4 = vector.shape_cast %3 : vector<1x16x128xf32> to vector<16x128xf32>
    %5 = arith.truncf %4 : vector<16x128xf32> to vector<16x128xbf16>
    %c0_3 = arith.constant 0 : index
    %c0_4 = arith.constant 0 : index
    %6 = vector.load %arg3[%c0_3, %c0_4] : memref<128x512xbf16, #tpu.memory_space<vmem>>, vector<128x512xbf16>
    %cst = arith.constant dense<0.000000e+00> : vector<16x512xf32>
    %7 = tpu.matmul %5, %6, %cst {dimension_numbers = #tpu.dot_dimension_numbers<[1], [0], [0], [1], [0, 0, 1, 1], [], []>} : vector<16x128xbf16>, vector<128x512xbf16>, vector<16x512xf32> -> vector<16x512xf32>
    %c0_5 = arith.constant 0 : index
    %c0_6 = arith.constant 0 : index
    %8 = vector.load %arg4[%c0_5, %c0_6] : memref<1x512xf32, #tpu.memory_space<vmem>>, vector<1x512xf32>
    %9 = vector.broadcast %8 : vector<1x512xf32> to vector<16x512xf32>
    %10 = arith.addf %7, %9 : vector<16x512xf32>
    %11 = vector.extract_strided_slice %10 {offsets = [0, 384], sizes = [16, 128], strides = [1, 1]} : vector<16x512xf32> to vector<16x128xf32>
    %c0_7 = arith.constant 0 : index
    %c0_8 = arith.constant 0 : index
    %c0_9 = arith.constant 0 : index
    %12 = vector.load %arg7[%c0_7, %c0_8, %c0_9] : memref<3x16x128xf32, #tpu.memory_space<vmem>>, vector<3x16x128xf32>
    %13 = vector.shape_cast %12 : vector<3x16x128xf32> to vector<48x128xf32>
    %c0_10 = arith.constant 0 : index
    %c0_11 = arith.constant 0 : index
    %c0_12 = arith.constant 0 : index
    %14 = vector.load %arg8[%c0_10, %c0_11, %c0_12] : memref<3x16x128xf32, #tpu.memory_space<vmem>>, vector<3x16x128xf32>
    %15 = vector.shape_cast %14 : vector<3x16x128xf32> to vector<48x128xf32>
    %cst_13 = arith.constant 0.000000e+00 : f32
    %16 = vector.broadcast %cst_13 : f32 to vector<16x128xf32>
    %cst_14 = arith.constant 0.000000e+00 : f32
    %17 = vector.broadcast %cst_14 : f32 to vector<16x128xf32>
    %c0_15 = arith.constant 0 : index
    %c0_16 = arith.constant 0 : index
    %c0_17 = arith.constant 0 : index
    %c0_18 = arith.constant 0 : index
    %18 = vector.load %arg2[%c0_15, %c0_16, %c0_17, %c0_18] : memref<1x4x16x48xf32, #tpu.memory_space<vmem>>, vector<1x1x16x48xf32>
    %19 = vector.shape_cast %18 : vector<1x1x16x48xf32> to vector<16x48xf32>
    %cst_19 = arith.constant dense<0.000000e+00> : vector<16x128xf32>
    %20 = tpu.matmul %19, %15, %cst_19 {dimension_numbers = #tpu.dot_dimension_numbers<[1], [0], [0], [1], [0, 0, 1, 1], [], []>} : vector<16x48xf32>, vector<48x128xf32>, vector<16x128xf32> -> vector<16x128xf32>
    %cst_20 = arith.constant dense<0.000000e+00> : vector<16x128xf32>
    %21 = tpu.matmul %19, %13, %cst_20 {dimension_numbers = #tpu.dot_dimension_numbers<[1], [0], [0], [1], [0, 0, 1, 1], [], []>} : vector<16x48xf32>, vector<48x128xf32>, vector<16x128xf32> -> vector<16x128xf32>
    %22 = arith.addf %16, %20 : vector<16x128xf32>
    %23 = arith.truncf %20 : vector<16x128xf32> to vector<16x128xbf16>
    %c0_21 = arith.constant 0 : index
    %c0_22 = arith.constant 0 : index
    %24 = vector.load %arg6[%c0_21, %c0_22] : memref<128x128xbf16, #tpu.memory_space<vmem>>, vector<128x128xbf16>
    %cst_23 = arith.constant dense<0.000000e+00> : vector<16x128xf32>
    %25 = tpu.matmul %23, %24, %cst_23 {dimension_numbers = #tpu.dot_dimension_numbers<[1], [0], [0], [1], [0, 0, 1, 1], [], []>} : vector<16x128xbf16>, vector<128x128xbf16>, vector<16x128xf32> -> vector<16x128xf32>
    %26 = arith.addf %25, %11 : vector<16x128xf32>
    %27 = arith.negf %26 : vector<16x128xf32>
    %28 = math.exp %27 : vector<16x128xf32>
    %cst_24 = arith.constant 1.000000e+00 : f32
    %29 = vector.broadcast %cst_24 : f32 to vector<16x128xf32>
    %30 = arith.addf %29, %28 : vector<16x128xf32>
    %31 = arith.divf %29, %30 : vector<16x128xf32>
    %32 = arith.mulf %31, %21 : vector<16x128xf32>
    %33 = arith.addf %17, %32 : vector<16x128xf32>
    %c0_25 = arith.constant 0 : index
    %c1 = arith.constant 1 : index
    %c0_26 = arith.constant 0 : index
    %c0_27 = arith.constant 0 : index
    %34 = vector.load %arg2[%c0_25, %c1, %c0_26, %c0_27] : memref<1x4x16x48xf32, #tpu.memory_space<vmem>>, vector<1x1x16x48xf32>
    %35 = vector.shape_cast %34 : vector<1x1x16x48xf32> to vector<16x48xf32>
    %cst_28 = arith.constant dense<0.000000e+00> : vector<16x128xf32>
    %36 = tpu.matmul %35, %15, %cst_28 {dimension_numbers = #tpu.dot_dimension_numbers<[1], [0], [0], [1], [0, 0, 1, 1], [], []>} : vector<16x48xf32>, vector<48x128xf32>, vector<16x128xf32> -> vector<16x128xf32>
    %cst_29 = arith.constant dense<0.000000e+00> : vector<16x128xf32>
    %37 = tpu.matmul %35, %13, %cst_29 {dimension_numbers = #tpu.dot_dimension_numbers<[1], [0], [0], [1], [0, 0, 1, 1], [], []>} : vector<16x48xf32>, vector<48x128xf32>, vector<16x128xf32> -> vector<16x128xf32>
    %38 = arith.addf %22, %36 : vector<16x128xf32>
    %39 = arith.truncf %36 : vector<16x128xf32> to vector<16x128xbf16>
    %c0_30 = arith.constant 0 : index
    %c0_31 = arith.constant 0 : index
    %40 = vector.load %arg6[%c0_30, %c0_31] : memref<128x128xbf16, #tpu.memory_space<vmem>>, vector<128x128xbf16>
    %cst_32 = arith.constant dense<0.000000e+00> : vector<16x128xf32>
    %41 = tpu.matmul %39, %40, %cst_32 {dimension_numbers = #tpu.dot_dimension_numbers<[1], [0], [0], [1], [0, 0, 1, 1], [], []>} : vector<16x128xbf16>, vector<128x128xbf16>, vector<16x128xf32> -> vector<16x128xf32>
    %42 = arith.addf %41, %11 : vector<16x128xf32>
    %43 = arith.negf %42 : vector<16x128xf32>
    %44 = math.exp %43 : vector<16x128xf32>
    %cst_33 = arith.constant 1.000000e+00 : f32
    %45 = vector.broadcast %cst_33 : f32 to vector<16x128xf32>
    %46 = arith.addf %45, %44 : vector<16x128xf32>
    %47 = arith.divf %45, %46 : vector<16x128xf32>
    %48 = arith.mulf %47, %37 : vector<16x128xf32>
    %49 = arith.addf %33, %48 : vector<16x128xf32>
    %c0_34 = arith.constant 0 : index
    %c2 = arith.constant 2 : index
    %c0_35 = arith.constant 0 : index
    %c0_36 = arith.constant 0 : index
    %50 = vector.load %arg2[%c0_34, %c2, %c0_35, %c0_36] : memref<1x4x16x48xf32, #tpu.memory_space<vmem>>, vector<1x1x16x48xf32>
    %51 = vector.shape_cast %50 : vector<1x1x16x48xf32> to vector<16x48xf32>
    %cst_37 = arith.constant dense<0.000000e+00> : vector<16x128xf32>
    %52 = tpu.matmul %51, %15, %cst_37 {dimension_numbers = #tpu.dot_dimension_numbers<[1], [0], [0], [1], [0, 0, 1, 1], [], []>} : vector<16x48xf32>, vector<48x128xf32>, vector<16x128xf32> -> vector<16x128xf32>
    %cst_38 = arith.constant dense<0.000000e+00> : vector<16x128xf32>
    %53 = tpu.matmul %51, %13, %cst_38 {dimension_numbers = #tpu.dot_dimension_numbers<[1], [0], [0], [1], [0, 0, 1, 1], [], []>} : vector<16x48xf32>, vector<48x128xf32>, vector<16x128xf32> -> vector<16x128xf32>
    %54 = arith.addf %38, %52 : vector<16x128xf32>
    %55 = arith.truncf %52 : vector<16x128xf32> to vector<16x128xbf16>
    %c0_39 = arith.constant 0 : index
    %c0_40 = arith.constant 0 : index
    %56 = vector.load %arg6[%c0_39, %c0_40] : memref<128x128xbf16, #tpu.memory_space<vmem>>, vector<128x128xbf16>
    %cst_41 = arith.constant dense<0.000000e+00> : vector<16x128xf32>
    %57 = tpu.matmul %55, %56, %cst_41 {dimension_numbers = #tpu.dot_dimension_numbers<[1], [0], [0], [1], [0, 0, 1, 1], [], []>} : vector<16x128xbf16>, vector<128x128xbf16>, vector<16x128xf32> -> vector<16x128xf32>
    %58 = arith.addf %57, %11 : vector<16x128xf32>
    %59 = arith.negf %58 : vector<16x128xf32>
    %60 = math.exp %59 : vector<16x128xf32>
    %cst_42 = arith.constant 1.000000e+00 : f32
    %61 = vector.broadcast %cst_42 : f32 to vector<16x128xf32>
    %62 = arith.addf %61, %60 : vector<16x128xf32>
    %63 = arith.divf %61, %62 : vector<16x128xf32>
    %64 = arith.mulf %63, %53 : vector<16x128xf32>
    %65 = arith.addf %49, %64 : vector<16x128xf32>
    %c0_43 = arith.constant 0 : index
    %c3 = arith.constant 3 : index
    %c0_44 = arith.constant 0 : index
    %c0_45 = arith.constant 0 : index
    %66 = vector.load %arg2[%c0_43, %c3, %c0_44, %c0_45] : memref<1x4x16x48xf32, #tpu.memory_space<vmem>>, vector<1x1x16x48xf32>
    %67 = vector.shape_cast %66 : vector<1x1x16x48xf32> to vector<16x48xf32>
    %cst_46 = arith.constant dense<0.000000e+00> : vector<16x128xf32>
    %68 = tpu.matmul %67, %15, %cst_46 {dimension_numbers = #tpu.dot_dimension_numbers<[1], [0], [0], [1], [0, 0, 1, 1], [], []>} : vector<16x48xf32>, vector<48x128xf32>, vector<16x128xf32> -> vector<16x128xf32>
    %cst_47 = arith.constant dense<0.000000e+00> : vector<16x128xf32>
    %69 = tpu.matmul %67, %13, %cst_47 {dimension_numbers = #tpu.dot_dimension_numbers<[1], [0], [0], [1], [0, 0, 1, 1], [], []>} : vector<16x48xf32>, vector<48x128xf32>, vector<16x128xf32> -> vector<16x128xf32>
    %70 = arith.addf %54, %68 : vector<16x128xf32>
    %71 = arith.truncf %68 : vector<16x128xf32> to vector<16x128xbf16>
    %c0_48 = arith.constant 0 : index
    %c0_49 = arith.constant 0 : index
    %72 = vector.load %arg6[%c0_48, %c0_49] : memref<128x128xbf16, #tpu.memory_space<vmem>>, vector<128x128xbf16>
    %cst_50 = arith.constant dense<0.000000e+00> : vector<16x128xf32>
    %73 = tpu.matmul %71, %72, %cst_50 {dimension_numbers = #tpu.dot_dimension_numbers<[1], [0], [0], [1], [0, 0, 1, 1], [], []>} : vector<16x128xbf16>, vector<128x128xbf16>, vector<16x128xf32> -> vector<16x128xf32>
    %74 = arith.addf %73, %11 : vector<16x128xf32>
    %75 = arith.negf %74 : vector<16x128xf32>
    %76 = math.exp %75 : vector<16x128xf32>
    %cst_51 = arith.constant 1.000000e+00 : f32
    %77 = vector.broadcast %cst_51 : f32 to vector<16x128xf32>
    %78 = arith.addf %77, %76 : vector<16x128xf32>
    %79 = arith.divf %77, %78 : vector<16x128xf32>
    %80 = arith.mulf %79, %69 : vector<16x128xf32>
    %81 = arith.addf %65, %80 : vector<16x128xf32>
    %82 = vector.extract_strided_slice %10 {offsets = [0, 0], sizes = [16, 384], strides = [1, 1]} : vector<16x512xf32> to vector<16x384xf32>
    %83 = arith.truncf %70 : vector<16x128xf32> to vector<16x128xbf16>
    %c0_52 = arith.constant 0 : index
    %c0_53 = arith.constant 0 : index
    %84 = vector.load %arg5[%c0_52, %c0_53] : memref<128x384xbf16, #tpu.memory_space<vmem>>, vector<128x384xbf16>
    %cst_54 = arith.constant dense<0.000000e+00> : vector<16x384xf32>
    %85 = tpu.matmul %83, %84, %cst_54 {dimension_numbers = #tpu.dot_dimension_numbers<[1], [0], [0], [1], [0, 0, 1, 1], [], []>} : vector<16x128xbf16>, vector<128x384xbf16>, vector<16x384xf32> -> vector<16x384xf32>
    %86 = arith.addf %82, %85 : vector<16x384xf32>
    %87 = vector.extract_strided_slice %86 {offsets = [0, 0], sizes = [16, 128], strides = [1, 1]} : vector<16x384xf32> to vector<16x128xf32>
    %88 = arith.negf %87 : vector<16x128xf32>
    %89 = math.exp %88 : vector<16x128xf32>
    %cst_55 = arith.constant 1.000000e+00 : f32
    %90 = vector.broadcast %cst_55 : f32 to vector<16x128xf32>
    %91 = arith.addf %90, %89 : vector<16x128xf32>
    %92 = arith.divf %90, %91 : vector<16x128xf32>
    %93 = vector.extract_strided_slice %86 {offsets = [0, 128], sizes = [16, 128], strides = [1, 1]} : vector<16x384xf32> to vector<16x128xf32>
    %94 = arith.negf %93 : vector<16x128xf32>
    %95 = math.exp %94 : vector<16x128xf32>
    %cst_56 = arith.constant 1.000000e+00 : f32
    %96 = vector.broadcast %cst_56 : f32 to vector<16x128xf32>
    %97 = arith.addf %96, %95 : vector<16x128xf32>
    %98 = arith.divf %96, %97 : vector<16x128xf32>
    %99 = vector.extract_strided_slice %86 {offsets = [0, 256], sizes = [16, 128], strides = [1, 1]} : vector<16x384xf32> to vector<16x128xf32>
    %100 = math.tanh %99 : vector<16x128xf32>
    %101 = arith.mulf %92, %100 : vector<16x128xf32>
    %102 = arith.addf %101, %81 : vector<16x128xf32>
    %103 = math.tanh %102 : vector<16x128xf32>
    %104 = arith.mulf %98, %103 : vector<16x128xf32>
    %105 = arith.index_cast %arg0 : i32 to index
    %c0_57 = arith.constant 0 : index
    %c0_58 = arith.constant 0 : index
    %106 = vector.load %arg7[%105, %c0_57, %c0_58] : memref<3x16x128xf32, #tpu.memory_space<vmem>>, vector<1x16x128xf32>
    %107 = vector.shape_cast %106 : vector<1x16x128xf32> to vector<16x128xf32>
    %108 = vector.shape_cast %102 : vector<16x128xf32> to vector<1x16x128xf32>
    tpu.vector_store %arg7[%105, %c0_57, %c0_58], %108 {strides = array<i32>} : memref<3x16x128xf32, #tpu.memory_space<vmem>>, vector<1x16x128xf32>,
    %109 = arith.index_cast %arg0 : i32 to index
    %c0_59 = arith.constant 0 : index
    %c0_60 = arith.constant 0 : index
    %110 = vector.load %arg8[%109, %c0_59, %c0_60] : memref<3x16x128xf32, #tpu.memory_space<vmem>>, vector<1x16x128xf32>
    %111 = vector.shape_cast %110 : vector<1x16x128xf32> to vector<16x128xf32>
    %112 = vector.shape_cast %104 : vector<16x128xf32> to vector<1x16x128xf32>
    tpu.vector_store %arg8[%109, %c0_59, %c0_60], %112 {strides = array<i32>} : memref<3x16x128xf32, #tpu.memory_space<vmem>>, vector<1x16x128xf32>,
    return
  }
  func.func @transform_0(%arg0: i32) -> (i32, i32, i32) {
    %c0_i32 = arith.constant 0 : i32
    %c0_i32_0 = arith.constant 0 : i32
    %c0_i32_1 = arith.constant 0 : i32
    return %arg0, %c0_i32, %c0_i32_0 : i32, i32, i32
  }
  func.func @transform_1(%arg0: i32) -> (i32, i32, i32, i32) {
    %c0_i32 = arith.constant 0 : i32
    %c0_i32_0 = arith.constant 0 : i32
    %c0_i32_1 = arith.constant 0 : i32
    %c0_i32_2 = arith.constant 0 : i32
    return %arg0, %c0_i32, %c0_i32_0, %c0_i32_1 : i32, i32, i32, i32
  }
  func.func @transform_2(%arg0: i32) -> (i32, i32) {
    %c0_i32 = arith.constant 0 : i32
    %c0_i32_0 = arith.constant 0 : i32
    %c0_i32_1 = arith.constant 0 : i32
    return %c0_i32, %c0_i32_0 : i32, i32
  }
  func.func @transform_3(%arg0: i32) -> (i32, i32) {
    %c0_i32 = arith.constant 0 : i32
    %c0_i32_0 = arith.constant 0 : i32
    %c0_i32_1 = arith.constant 0 : i32
    return %c0_i32, %c0_i32_0 : i32, i32
  }
  func.func @transform_4(%arg0: i32) -> (i32, i32) {
    %c0_i32 = arith.constant 0 : i32
    %c0_i32_0 = arith.constant 0 : i32
    %c0_i32_1 = arith.constant 0 : i32
    return %c0_i32, %c0_i32_0 : i32, i32
  }
  func.func @transform_5(%arg0: i32) -> (i32, i32) {
    %c0_i32 = arith.constant 0 : i32
    %c0_i32_0 = arith.constant 0 : i32
    %c0_i32_1 = arith.constant 0 : i32
    return %c0_i32, %c0_i32_0 : i32, i32
  }
  func.func @transform_6(%arg0: i32) -> (i32, i32, i32) {
    %c0_i32 = arith.constant 0 : i32
    %c0_i32_0 = arith.constant 0 : i32
    %c0_i32_1 = arith.constant 0 : i32
    %c0_i32_2 = arith.constant 0 : i32
    return %c0_i32, %c0_i32_0, %c0_i32_1 : i32, i32, i32
  }
  func.func @transform_7(%arg0: i32) -> (i32, i32, i32) {
    %c0_i32 = arith.constant 0 : i32
    %c0_i32_0 = arith.constant 0 : i32
    %c0_i32_1 = arith.constant 0 : i32
    %c0_i32_2 = arith.constant 0 : i32
    return %c0_i32, %c0_i32_0, %c0_i32_1 : i32, i32, i32
  }
}

</mosaic_0001>

<bundles_post_ra>
// kernel: tree_lstm_forward.1
= control target key start
LH: loop header
LB: loop body
LE: loop exit
PB: predicated region body
PF: predicated region fallthrough
CT: control target
= control target key end

     0   :  { %s3158_s0 = inlined_call_operand.hbm [shape: f32[3,16,128], index: 0, kind: input, shape index: {}]   ;;  %s3159_s1 = inlined_call_operand.hbm [shape: f32[3,4,16,48], index: 1, kind: input, shape index: {}]   ;;  %s3160_s2 = inlined_call_operand.hbm [shape: bf16[128,512], index: 2, kind: input, shape index: {}]   ;;  %s3161_s3 = inlined_call_operand.hbm [shape: f32[1,512], index: 3, kind: input, shape index: {}]   ;;  %s3162_s4 = inlined_call_operand.hbm [shape: bf16[128,384], index: 4, kind: input, shape index: {}]   ;;  %s3163_s5 = inlined_call_operand.hbm [shape: bf16[128,128], index: 5, kind: input, shape index: {}]   ;;  %s3164_s6 = inlined_call_operand.hbm [shape: f32[3,16,128], index: 6, kind: output, shape index: {0}]   ;;  %s3165_s7 = inlined_call_operand.hbm [shape: f32[3,16,128], index: 7, kind: output, shape index: {1}]  }
   0x1   :  { %3166 = sst [smem:[#allocation23_spill]] %s3158_s0 }
   0x2   :  { %3167 = sst [smem:[#allocation24_spill]] %s3160_s2 }
   0x3   :  { %3168 = sst [smem:[#allocation25_spill]] %s3161_s3 }
   0x4   :  { %3169 = sst [smem:[#allocation26_spill]] %s3162_s4 }
   0x5   :  { %13 = vsyncpa [#allocation3], 0 }
   0x6   :  { %15 = vsyncpa [#allocation3 + $0x1], 0 }
   0x7   :  { %16 = vsyncpa [#allocation6], 0 }
   0x8   :  { %18 = vsyncpa [#allocation6 + $0x1], 0 }
   0x9   :  { %19 = vsyncpa [#allocation9], 0 }
   0xa   :  { %20 = vsyncpa [#allocation12], 0 }
   0xb   :  { %21 = vsyncpa [#allocation4], 0 }
   0xc   :  { %22 = vsyncpa [#allocation15], 0  ;;  %s2558_s24 = smov 0   ;;  %s2560_s25 = smov 0  }
   0xd   :  { %s2562_s26 = smov 0   ;;  %s2564_s27 = smov 0  }
   0xe LB: > { %s2577_s28 = sadd.s32 4294967295, %s2499_s27   ;;  %p48_p0 = scmp.ne.s32.totalorder %s2491_s25, %s2487_s24  ;;  %s2499_s27 = sphi %s2564_s27, %s3195_s27   ;;  %s2495_s26 = sphi %s2562_s26, %s3194_s26   ;;  %s2491_s25 = sphi %s2560_s25, %s3193_s25   ;;  %s2487_s24 = sphi %s2558_s24, %s3192_s24  }
   0xf   : > { %p49_p1 = scmp.eq.s32.totalorder %s2577_s28, 0  ;;  %p1656_p2 = scmp.ge.s32.totalorder %s2499_s27, 1 }
  0x10   : > { %p211_p3 = scmp.lt.s32.totalorder %s2499_s27, 4  ;;  %p1657_p4 = scmp.ne.s32.totalorder %s2577_s28, 0 }
  0x11   : > { %p2586_p5 = por %p49_p1, %p48_p0  ;;  %s3171_s2 = sld [smem:[#allocation24_spill]] }
  0x12   : > { %p2593_p6 = pnand %p1656_p2, %p211_p3  ;;  %s2501_s11 = smov [#allocation7]  }
  0x13   : > { %s224_s12 = sshll.u32 %s2501_s11, 4  ;;  %s3174_s3 = sld [smem:[#allocation25_spill]]  ;;  %s225_s12 = int_to_ptr.vmem [resolvable:$true] %s224_s12 }
  0x14   : > { %p2067_p7 = pneg %p2593_p6  ;;  %s2502_s17 = smov 256  }
  0x15   : > { %s2503_s18 = smov 16   ;;  %s2504_s19 = smov [#allocation8]  }
  0x16   : > { %p2601_p8 = pnand %p2067_p7, %p49_p1  ;;  %s239_s20 = sshll.u32 %s2504_s19, 4  ;;  %s240_s20 = int_to_ptr.vmem [resolvable:$true] %s239_s20 }
  0x17   : > { %s222_s9 = sshll.u32 %s3171_s2, 4  ;;  %s3175_s4 = sld [smem:[#allocation26_spill]]  ;;  %s223_s9 = int_to_ptr.hbm [resolvable:$true] %s222_s9 }
  0x18   : > { %2070 = dma.hbm_to_vmem [thread:$0]  (!%p2601_p8), %s223_s9, 4096, %s225_s12, [#allocation6], %s2502_s17, %s2502_s17, %s2503_s18  }
  0x19   : > { %s237_s16 = sshll.u32 %s3174_s3, 4  ;;  %s2505_s24 = smov [#allocation10]   ;;  %s238_s16 = int_to_ptr.hbm [resolvable:$true] %s237_s16 }
  0x1a   : > { %2073 = dma.hbm_to_vmem [thread:$0]  (!%p2601_p8), %s238_s16, 64, %s240_s20, [#allocation9]  }
  0x1b   : > { %s250_s30 = sshll.u32 %s2505_s24, 4  ;;  %s262_s9 = sshll.u32 %s3163_s5, 4  ;;  %s251_s30 = int_to_ptr.vmem [resolvable:$true] %s250_s30  ;;  %s263_s9 = int_to_ptr.hbm [resolvable:$true] %s262_s9 }
  0x1c   : > { %s2506_s12 = smov 192   ;;  %s2507_s14 = smov 12  }
  0x1d   : > { %s248_s23 = sshll.u32 %s3175_s4, 4  ;;  %s2508_s15 = smov [#allocation11]   ;;  %s249_s23 = int_to_ptr.hbm [resolvable:$true] %s248_s23 }
  0x1e   : > { %2076 = dma.hbm_to_vmem [thread:$0]  (!%p2601_p8), %s249_s23, 3072, %s251_s30, [#allocation9], %s2506_s12, %s2506_s12, %s2507_s14  }
  0x1f   : > { %s264_s16 = sshll.u32 %s2508_s15, 4  ;;  %s2509_s17 = smov 64   ;;  %s265_s16 = int_to_ptr.vmem [resolvable:$true] %s264_s16 }
  0x20   : > { %s2510_s18 = smov 4   ;;  %s2623_s19 = sadd.s32 1, %s2499_s27  }
  0x21   : > { %2079 = dma.hbm_to_vmem [thread:$0]  (!%p2601_p8), %s263_s9, 1024, %s265_s16, [#allocation12], %s2509_s17, %s2509_s17, %s2510_s18  }
  0x22   : > { %s32_s20 = ssub.s32 %s2499_s27, %s2623_s19  ;;  %s35_s21 = sadd.s32 1, %s2495_s26 }
  0x23   : > { %p33_p9 = scmp.eq.s32.totalorder %s32_s20, 0  ;;  %p42_p10 = scmp.ne.s32.totalorder %s2495_s26, %s2491_s25 }
  0x24   : > { %p43_p11 = scmp.eq.s32.totalorder %s2499_s27, 0  ;;  %p2091_p13 = scmp.lt.s32.totalorder %s2499_s27, 3 }
  0x25   : > { %s2632_s22 = scalar_select %p33_p9, %s2495_s26, %s35_s21  }
  0x26   : > { %p44_p12 = por %p43_p11, %p42_p10  ;;  %s2636_s23 = sand.u32 1, %s2495_s26  }
  0x27   : > { %s1973_s24 = sshll.u32 %s2499_s27, 4  ;;  %s1662_s13 = sshll.u32 %s2636_s23, 4 }
  0x28   : > { %s3176_s0 = sld [smem:[#allocation23_spill]]  ;;  %s282_s12 = scalar_lea.vmem [#allocation2], %s1662_s13 }
  0x29   : > { %s290_s14 = sshll.u32 %s282_s12, 4  ;;  %p2643_p0 = pnand %p2091_p13, %p44_p12  ;;  %s291_s14 = int_to_ptr.vmem [resolvable:$true] %s290_s14 }
  0x2a   : > { %s300_s16 = sand.u32 1, %s2499_s27   ;;  %s279_s17 = scalar_lea.sflag [#allocation3], %s2636_s23 }
  0x2b   : > { %p2329_p3 = pneg %p2643_p0 }
  0x2e   : > { %s287_s11 = scalar_lea.hbm %s3176_s0, %s1973_s24  ;;  %s2332_s13 = scalar_lea.hbm %s3176_s0, 48 }
  0x2f   : > { %s288_s9 = sshll.u32 %s287_s11, 4  ;;  %s289_s9 = int_to_ptr.hbm [resolvable:$true] %s288_s9 }
  0x30   : > { %s2325_s18 = sshra.s32 %s289_s9, 4  ;;  %s2326_s18 = int_to_ptr.hbm [resolvable:$true] %s2325_s18 }
  0x31   : > { %s2327_s20 = scalar_lea.hbm %s2326_s18, 16  ;;  %p2333_p9 = scmp.lt.s32.totalorder %s2326_s18, %s3176_s0 }
  0x32   : > { %p2328_p2 = scmp.ne.s32.totalorder %s2326_s18, %s2327_s20  ;;  %p2334_p10 = scmp.lt.s32.totalorder %s2332_s13, %s2327_s20 }
  0x34   : > { %p2330_p7 = pnand %p2329_p3, %p2328_p2  ;;  %p2335_p11 = por %p2334_p10, %p2333_p9 }
  0x36   : > { %p2331_p8 = pneg %p2330_p7 }
  0x38   : > { %p2336_p12 = pnand %p2335_p11, %p2331_p8 }
  0x3a   : > { %2339 = shalt.err (!%p2336_p12)
}
  0x3b   : > { %s2511_s11 = smov 128   ;;  %s2512_s12 = smov 8  }
  0x3c   : > { %2083 = dma.hbm_to_vmem [thread:$0]  (!%p2643_p0), %s289_s9, 256, %s291_s14, %s279_s17, %s2511_s11, %s2511_s11, %s2512_s12  }
  0x3d   : > { %s1665_s2 = sshll.u32 %s2636_s23, 6  ;;  %s1974_s3 = sshll.u32 %s2499_s27, 6 }
  0x3e   : > { %s309_s4 = scalar_lea.hbm %s3159_s1, %s1974_s3  ;;  %s304_s18 = scalar_lea.vmem [#allocation5], %s1665_s2 }
  0x3f   : > { %s310_s30 = sshll.u32 %s309_s4, 4  ;;  %s312_s20 = sshll.u32 %s304_s18, 4  ;;  %s311_s30 = int_to_ptr.hbm [resolvable:$true] %s310_s30  ;;  %s313_s20 = int_to_ptr.vmem [resolvable:$true] %s312_s20 }
  0x40   : > { %s301_s13 = scalar_lea.sflag [#allocation6], %s300_s16  ;;  %s2355_s8 = sshra.s32 %s311_s30, 4  ;;  %s2356_s8 = int_to_ptr.hbm [resolvable:$true] %s2355_s8 }
  0x41   : > { %s2357_s0 = scalar_lea.hbm %s2356_s8, 64  ;;  %s2362_s9 = scalar_lea.hbm %s3159_s1, 192 }
  0x42   : > { %p2358_p13 = scmp.ne.s32.totalorder %s2356_s8, %s2357_s0  ;;  %p2363_p8 = scmp.lt.s32.totalorder %s2356_s8, %s3159_s1 }
  0x43   : > { %p2364_p9 = scmp.lt.s32.totalorder %s2362_s9, %s2357_s0 }
  0x44   : > { %p2360_p2 = pnand %p2358_p13, %p2329_p3 }
  0x45   : > { %p2365_p10 = por %p2364_p9, %p2363_p8 }
  0x46   : > { %p2361_p7 = pneg %p2360_p2 }
  0x48   : > { %p2366_p11 = pnand %p2365_p10, %p2361_p7 }
  0x4a   : > { %2369 = shalt.err (!%p2366_p11)
}
  0x4b   : > { %2086 = dma.hbm_to_vmem [thread:$0]  (!%p2643_p0), %s311_s30, 1024, %s313_s20, %s301_s13, %s2511_s11, %s2511_s11, %s2512_s12  }
  0x4c   : > { %324 = sbr.rel (%p2593_p6) target bundleno = 531 (0x213), region = 44  ;;  %s326_s2 = sand.u32 (!%p2593_p6), 1, %s2491_s25  }
  0x4d   : > { %s1669_s4 = sshll.u32 (!%p2593_p6), %s326_s2, 4  ;;  %s327_s16 = scalar_lea.sflag (!%p2593_p6), [#allocation3], %s326_s2 }
  0x4e   : > { %s2681_s17 = scalar_lea.vmem (!%p2593_p6), [#allocation2], %s1669_s4 }
  0x51   : > { %2458 = dma.done.wait (%p2586_p5), %s327_s16, 256  }
  0x52   : > { %2460 = vsyncadd (%p2586_p5), %s327_s16, 4294967040  ;;  %s336_s0 = sand.u32 1, %s2577_s28   ;;  %s1670_s15 = sshll.u32 %s326_s2, 6 }
  0x53   : > { %s337_s11 = scalar_lea.sflag [#allocation6], %s336_s0  ;;  %s2688_s12 = scalar_lea.vmem [#allocation5], %s1670_s15 }
  0x54   : > { %2462 = dma.done.wait (%p2586_p5), %s337_s11, 1024  }
  0x55   : > { %2464 = vsyncadd (%p2586_p5), %s337_s11, 4294966272 }
  0x56   : > { %2466 = dma.done.wait (%p49_p1), [#allocation6], 4096  }
  0x57   : > { %2468 = vsyncadd (%p49_p1), [#allocation6], 4294963200 }
  0x58   : > { %2470 = dma.done.wait (%p49_p1), [#allocation9], 3136  }
  0x59   : > { %2472 = vsyncadd (%p49_p1), [#allocation9], 4294964160 }
  0x5a   : > { %2474 = dma.done.wait (%p49_p1), [#allocation12], 1024  }
  0x5b   : > { %2476 = vsyncadd (%p49_p1), [#allocation12], 4294966272  ;;  %395 = sbr.rel (%p1657_p4) target bundleno = 109 (0x6d), region = 72 }
  0x60   : > { %v2513_v0 = vmov 0.0  }
  0x61   : > { %396 = vst [vmem:[#allocation13] sm:$0xff] %v2513_v0 }
  0x62   : > { %397 = vst [vmem:[#allocation13 + $0x8] sm:$0xff] %v2513_v0 }
  0x63   : > { %398 = vst [vmem:[#allocation13 + $0x10] sm:$0xff] %v2513_v0 }
  0x64   : > { %399 = vst [vmem:[#allocation13 + $0x18] sm:$0xff] %v2513_v0 }
  0x65   : > { %400 = vst [vmem:[#allocation13 + $0x20] sm:$0xff] %v2513_v0 }
  0x66   : > { %401 = vst [vmem:[#allocation13 + $0x28] sm:$0xff] %v2513_v0 }
  0x67   : > { %402 = vst [vmem:[#allocation14] sm:$0xff] %v2513_v0 }
  0x68   : > { %403 = vst [vmem:[#allocation14 + $0x8] sm:$0xff] %v2513_v0 }
  0x69   : > { %404 = vst [vmem:[#allocation14 + $0x10] sm:$0xff] %v2513_v0 }
  0x6a   : > { %405 = vst [vmem:[#allocation14 + $0x18] sm:$0xff] %v2513_v0 }
  0x6b   : > { %406 = vst [vmem:[#allocation14 + $0x20] sm:$0xff] %v2513_v0 }
  0x6c   : > { %407 = vst [vmem:[#allocation14 + $0x28] sm:$0xff] %v2513_v0 }
  0x6d PF: > { %v1790_v1 = vld [vmem:[#allocation7 + $0xe0] sm:$0xf]  ;;  %v2005_v2 = vld [vmem:[#allocation7 + $0xec] sm:$0xf0]  ;;  %v2004_v3 = vld [vmem:[#allocation7 + $0xec] sm:$0xf] }
  0x6e   : > { %v1791_v4 = vor.u32 %v2005_v2, %v1790_v1  ;;  %v1800_v5 = vld [vmem:[#allocation7 + $0xf8] sm:$0xf0]  ;;  %v1774_v6 = vld [vmem:[#allocation7 + $0xc0] sm:$0xf]  ;;  %v2001_v7 = vld [vmem:[#allocation7 + $0xcc] sm:$0xf0] }
  0x6f   : > { %v1803_v8 = vor.u32 %v2004_v3, %v1800_v5  ;;  %v2000_v9 = vld [vmem:[#allocation7 + $0xcc] sm:$0xf]  ;;  %v1784_v10 = vld [vmem:[#allocation7 + $0xd8] sm:$0xf0]  ;;  %v1775_v11 = vor.u32 %v2001_v7, %v1774_v6  ;;  %v1758_v13 = vld [vmem:[#allocation7 + $0xa0] sm:$0xf] }
  0x70   : > { %613 = vmatpush.bf16.msra.mxu0 %v1791_v4  ;;  %v1787_v12 = vor.u32 %v2000_v9, %v1784_v10  ;;  %v1997_v14 = vld [vmem:[#allocation7 + $0xac] sm:$0xf0]  ;;  %v1996_v15 = vld [vmem:[#allocation7 + $0xac] sm:$0xf]  ;;  %v1768_v16 = vld [vmem:[#allocation7 + $0xb8] sm:$0xf0] }
  0x71   : > { %655 = vmatpush.bf16.msra.mxu3 %v1803_v8  ;;  %v1759_v17 = vor.u32 %v1997_v14, %v1758_v13  ;;  %v1771_v18 = vor.u32 %v1996_v15, %v1768_v16  ;;  %v1742_v19 = vld [vmem:[#allocation7 + $0x80] sm:$0xf]  ;;  %v1993_v20 = vld [vmem:[#allocation7 + $0x8c] sm:$0xf0]  ;;  %v1992_v21 = vld [vmem:[#allocation7 + $0x8c] sm:$0xf] }
  0x72   : > { %v1752_v22 = vld [vmem:[#allocation7 + $0x98] sm:$0xf0]  ;;  %v1743_v23 = vor.u32 %v1993_v20, %v1742_v19  ;;  %v1726_v25 = vld [vmem:[#allocation7 + $0x60] sm:$0xf]  ;;  %v1989_v26 = vld [vmem:[#allocation7 + $0x6c] sm:$0xf0] }
  0x73   : > { %v1755_v24 = vor.u32 %v1992_v21, %v1752_v22  ;;  %v1988_v27 = vld [vmem:[#allocation7 + $0x6c] sm:$0xf]  ;;  %v1736_v28 = vld [vmem:[#allocation7 + $0x78] sm:$0xf0]  ;;  %v1727_v29 = vor.u32 %v1989_v26, %v1726_v25  ;;  %v1710_v31 = vld [vmem:[#allocation7 + $0x40] sm:$0xf] }
  0x74   : > { %614 = vmatpush.bf16.msra.mxu0 %v1775_v11  ;;  %v1739_v30 = vor.u32 %v1988_v27, %v1736_v28  ;;  %v1985_v32 = vld [vmem:[#allocation7 + $0x4c] sm:$0xf0]  ;;  %v1984_v33 = vld [vmem:[#allocation7 + $0x4c] sm:$0xf]  ;;  %v1720_v34 = vld [vmem:[#allocation7 + $0x58] sm:$0xf0] }
  0x75   : > { %656 = vmatpush.bf16.msra.mxu3 %v1787_v12  ;;  %v1711_v35 = vor.u32 %v1985_v32, %v1710_v31  ;;  %v1723_v36 = vor.u32 %v1984_v33, %v1720_v34  ;;  %v1694_v37 = vld [vmem:[#allocation7 + $0x20] sm:$0xf]  ;;  %v1981_v38 = vld [vmem:[#allocation7 + $0x2c] sm:$0xf0]  ;;  %v1980_v39 = vld [vmem:[#allocation7 + $0x2c] sm:$0xf] }
  0x76   : > { %v1704_v40 = vld [vmem:[#allocation7 + $0x38] sm:$0xf0]  ;;  %v1695_v41 = vor.u32 %v1981_v38, %v1694_v37  ;;  %v1678_v43 = vld [vmem:[#allocation7] sm:$0xf]  ;;  %v1977_v44 = vld [vmem:[#allocation7 + $0xc] sm:$0xf0] }
  0x77   : > { %v1707_v42 = vor.u32 %v1980_v39, %v1704_v40  ;;  %v1976_v45 = vld [vmem:[#allocation7 + $0xc] sm:$0xf]  ;;  %v1688_v46 = vld [vmem:[#allocation7 + $0x18] sm:$0xf0]  ;;  %v1679_v47 = vor.u32 %v1977_v44, %v1678_v43  ;;  %v408_v48 = vld [vmem:[%s2681_s17] sm:$0xff]  ;;  %vm683_vm0 = vcmask 392192  }
  0x78   : > { %615 = vmatpush.bf16.msra.mxu0 %v1759_v17  ;;  %v409_v49 = vld [vmem:[%s2681_s17 + $0x8] sm:$0xff]  ;;  %v1691_v50 = vor.u32 %v1976_v45, %v1688_v46  ;;  %v2715_v58 = vld [vmem:[%s2688_s12] sm:$0xff]  ;;  %v2718_v59 = vld [vmem:[%s2688_s12 + $0x10] sm:$0xff]  ;;  %s1966_s29 = sshll.u32 %s2577_s28, 4  ;;  %s2514_s24 = smov [#allocation13]  }
  0x79   : > { %657 = vmatpush.bf16.msra.mxu3 %v1771_v18  ;;  %v680_v51 = vld [vmem:[#allocation14 + $0x28] sm:$0xff]  ;;  %v2710_v52 = vpack.c.bf16 %v409_v49, %v408_v48  ;;  %v679_v53 = vld [vmem:[#allocation14 + $0x20] sm:$0xff]  ;;  %v678_v54 = vld [vmem:[#allocation14 + $0x18] sm:$0xff]  ;;  %s3106_s10 = scalar_lea.vmem [#allocation13], %s1966_s29  ;;  %s3118_s21 = scalar_lea.vmem [#allocation14], %s1966_s29 }
  0x7a   : > { %v677_v55 = vld [vmem:[#allocation14 + $0x10] sm:$0xff]  ;;  %v676_v56 = vld [vmem:[#allocation14 + $0x8] sm:$0xff]  ;;  %v675_v57 = vld [vmem:[#allocation14] sm:$0xff]  ;;  %s1508_s30 = sshll.u32 %s2514_s24, 4  ;;  %s1510_s13 = sshll.u32 %s3164_s6, 4  ;;  %s1509_s30 = int_to_ptr.vmem [resolvable:$true] %s1508_s30  ;;  %s1511_s13 = int_to_ptr.hbm [resolvable:$true] %s1510_s13 }
  0x7b   : > { %v2725_v60 = vld [vmem:[%s2688_s12 + $0x8] sm:$0xff]  ;;  %v2728_v61 = vld [vmem:[%s2688_s12 + $0x18] sm:$0xff]  ;;  %v2003_v3 = vld [vmem:[#allocation7 + $0xe4] sm:$0xf]  ;;  %p2096_p1 = scmp.eq.s32.totalorder %s2577_s28, 2  ;;  %s2515_s8 = smov 128  }
  0x7c   : > { %616 = vmatpush.bf16.msra.mxu0 %v1743_v23  ;;  %v1798_v62 = vld [vmem:[#allocation7 + $0xe8] sm:$0xf]  ;;  %v2006_v63 = vld [vmem:[#allocation7 + $0xf4] sm:$0xf0]  ;;  %v1792_v6 = vld [vmem:[#allocation7 + $0xf0] sm:$0xf0] }
  0x7d   : > { %658 = vmatpush.bf16.msra.mxu3 %v1755_v24  ;;  %v1782_v0 = vld [vmem:[#allocation7 + $0xc8] sm:$0xf]  ;;  %v1799_v1 = vor.u32 %v2006_v63, %v1798_v62  ;;  %v2002_v2 = vld [vmem:[#allocation7 + $0xd4] sm:$0xf0]  ;;  %v1795_v8 = vor.u32 %v2003_v3, %v1792_v6  ;;  %v1999_v9 = vld [vmem:[#allocation7 + $0xc4] sm:$0xf] }
  0x7e   : > { %v1783_v4 = vor.u32 %v2002_v2, %v1782_v0  ;;  %v1766_v5 = vld [vmem:[#allocation7 + $0xa8] sm:$0xf]  ;;  %v1998_v7 = vld [vmem:[#allocation7 + $0xb4] sm:$0xf0]  ;;  %v1776_v10 = vld [vmem:[#allocation7 + $0xd0] sm:$0xf0] }
  0x7f   : > { %641 = vmatpush.bf16.msra.mxu2 %v1799_v1  ;;  %v2735_v11 = vld [vmem:[%s2688_s12 + $0x20] sm:$0xff]  ;;  %627 = vmatpush.bf16.msra.mxu1 %v1795_v8  ;;  %v1779_v12 = vor.u32 %v1999_v9, %v1776_v10  ;;  %v1767_v13 = vor.u32 %v1998_v7, %v1766_v5  ;;  %v1760_v15 = vld [vmem:[#allocation7 + $0xb0] sm:$0xf0]  ;;  %v1750_v16 = vld [vmem:[#allocation7 + $0x88] sm:$0xf]  ;;  %s2516_s23 = smov 8  }
  0x80   : > { %617 = vmatpush.bf16.msra.mxu0 %v1727_v29  ;;  %v1995_v14 = vld [vmem:[#allocation7 + $0xa4] sm:$0xf]  ;;  %v1994_v17 = vld [vmem:[#allocation7 + $0x94] sm:$0xf0]  ;;  %v1744_v21 = vld [vmem:[#allocation7 + $0x90] sm:$0xf0] }
  0x81   : > { %659 = vmatpush.bf16.msra.mxu3 %v1739_v30  ;;  %v1763_v18 = vor.u32 %v1995_v14, %v1760_v15  ;;  %v1751_v19 = vor.u32 %v1994_v17, %v1750_v16  ;;  %v1991_v20 = vld [vmem:[#allocation7 + $0x84] sm:$0xf]  ;;  %v1734_v22 = vld [vmem:[#allocation7 + $0x68] sm:$0xf]  ;;  %v1990_v23 = vld [vmem:[#allocation7 + $0x74] sm:$0xf0] }
  0x82   : > { %v2739_v24 = vld [vmem:[#allocation13 + $0x28] sm:$0xff]  ;;  %v1747_v26 = vor.u32 %v1991_v20, %v1744_v21  ;;  %v2745_v27 = vld [vmem:[#allocation13 + $0x20] sm:$0xff]  ;;  %v1735_v28 = vor.u32 %v1990_v23, %v1734_v22  ;;  %v1728_v30 = vld [vmem:[#allocation7 + $0x70] sm:$0xf0]  ;;  %s2517_s27 = smov [#allocation14]   ;;  %s1524_s2 = sshll.u32 %s3165_s7, 4  ;;  %s1525_s2 = int_to_ptr.hbm [resolvable:$true] %s1524_s2 }
  0x83   : > { %642 = vmatpush.bf16.msra.mxu2 %v1783_v4  ;;  %628 = vmatpush.bf16.msra.mxu1 %v1779_v12  ;;  %v2742_v25 = vld [vmem:[%s2688_s12 + $0x28] sm:$0xff]  ;;  %v1987_v29 = vld [vmem:[#allocation7 + $0x64] sm:$0xf]  ;;  %v1986_v32 = vld [vmem:[#allocation7 + $0x54] sm:$0xf0]  ;;  %s1522_s9 = sshll.u32 %s2517_s27, 4  ;;  %s1523_s9 = int_to_ptr.vmem [resolvable:$true] %s1522_s9 }
  0x84   : > { %618 = vmatpush.bf16.msra.mxu0 %v1711_v35  ;;  %v1718_v31 = vld [vmem:[#allocation7 + $0x48] sm:$0xf]  ;;  %v2750_v33 = vld [vmem:[#allocation13 + $0x18] sm:$0xff]  ;;  %v1731_v34 = vor.u32 %v1987_v29, %v1728_v30  ;;  %v2753_v35 = vld [vmem:[#allocation13 + $0x10] sm:$0xff] }
  0x85   : > { %660 = vmatpush.bf16.msra.mxu3 %v1723_v36  ;;  %v1719_v36 = vor.u32 %v1986_v32, %v1718_v31  ;;  %v1983_v37 = vld [vmem:[#allocation7 + $0x44] sm:$0xf]  ;;  %v1712_v38 = vld [vmem:[#allocation7 + $0x50] sm:$0xf0]  ;;  %v1702_v39 = vld [vmem:[#allocation7 + $0x28] sm:$0xf] }
  0x86   : > { %v1982_v40 = vld [vmem:[#allocation7 + $0x34] sm:$0xf0]  ;;  %v1715_v43 = vor.u32 %v1983_v37, %v1712_v38  ;;  %v1979_v45 = vld [vmem:[#allocation7 + $0x24] sm:$0xf]  ;;  %v1696_v46 = vld [vmem:[#allocation7 + $0x30] sm:$0xf0] }
  0x87   : > { %643 = vmatpush.bf16.msra.mxu2 %v1767_v13  ;;  %629 = vmatpush.bf16.msra.mxu1 %v1763_v18  ;;  %v1703_v44 = vor.u32 %v1982_v40, %v1702_v39  ;;  %v1978_v48 = vld [vmem:[#allocation7 + $0x14] sm:$0xf0]  ;;  %v1699_v49 = vor.u32 %v1979_v45, %v1696_v46  ;;  %v2777_v62 = vld [vmem:[#allocation11 + $0x28] sm:$0xff]  ;;  %v2783_v63 = vld [vmem:[#allocation11 + $0x20] sm:$0xff] }
  0x88   : > { %619 = vmatpush.bf16.msra.mxu0 %v1695_v41  ;;  %v2756_v41 = vld [vmem:[#allocation13 + $0x8] sm:$0xff]  ;;  %v2788_v0 = vld [vmem:[#allocation11 + $0x18] sm:$0xff]  ;;  %v2791_v1 = vld [vmem:[#allocation11 + $0x10] sm:$0xff] }
  0x89   : > { %661 = vmatpush.bf16.msra.mxu3 %v1707_v42  ;;  %v2759_v42 = vld [vmem:[%s2688_s12 + $0x30] sm:$0xff]  ;;  %v2801_v3 = vld [vmem:[#allocation11] sm:$0xff]  ;;  %v1954_v5 = vld [vmem:[#allocation10 + $0xb4] sm:$0xf0] }
  0x8a   : > { %v2794_v2 = vld [vmem:[#allocation11 + $0x8] sm:$0xff]  ;;  %v1940_v7 = vld [vmem:[#allocation10 + $0x90] sm:$0xf]  ;;  %v2034_v8 = vld [vmem:[#allocation10 + $0x98] sm:$0xf0] }
  0x8b   : > { %644 = vmatpush.bf16.msra.mxu2 %v1751_v19  ;;  %630 = vmatpush.bf16.msra.mxu1 %v1747_v26  ;;  %v2033_v9 = vld [vmem:[#allocation10 + $0x94] sm:$0xf]  ;;  %v1942_v12 = vld [vmem:[#allocation10 + $0x9c] sm:$0xf0]  ;;  %v1928_v15 = vld [vmem:[#allocation10 + $0x78] sm:$0xf] }
  0x8c   : > { %620 = vmatpush.bf16.msra.mxu0 %v1679_v47  ;;  %v1686_v47 = vld [vmem:[#allocation7 + $0x8] sm:$0xf]  ;;  %v1945_v14 = vor.u32 %v2033_v9, %v1942_v12  ;;  %v2030_v17 = vld [vmem:[#allocation10 + $0x7c] sm:$0xf]  ;;  %v1930_v19 = vld [vmem:[#allocation10 + $0x84] sm:$0xf0] }
  0x8d   : > { %662 = vmatpush.bf16.msra.mxu3 %v1691_v50  ;;  %v1687_v50 = vor.u32 %v1978_v48, %v1686_v47  ;;  %v2031_v16 = vld [vmem:[#allocation10 + $0x80] sm:$0xf0]  ;;  %v1933_v20 = vor.u32 %v2030_v17, %v1930_v19  ;;  %v1916_v21 = vld [vmem:[#allocation10 + $0x60] sm:$0xf]  ;;  %v2028_v22 = vld [vmem:[#allocation10 + $0x68] sm:$0xf0] }
  0x8e   : > { %v1929_v18 = vor.u32 %v2031_v16, %v1928_v15  ;;  %v2027_v23 = vld [vmem:[#allocation10 + $0x64] sm:$0xf]  ;;  %v1918_v26 = vld [vmem:[#allocation10 + $0x6c] sm:$0xf0]  ;;  %v1904_v29 = vld [vmem:[#allocation10 + $0x48] sm:$0xf] }
  0x8f   : > { %621 = vmatmul.bf16.vlgmr.msra.gmra.mxu0 %v2710_v52  ;;  %645 = vmatpush.bf16.msra.mxu2 %v1735_v28  ;;  %v1921_v28 = vor.u32 %v2027_v23, %v1918_v26  ;;  %v2025_v30 = vld [vmem:[#allocation10 + $0x50] sm:$0xf0]  ;;  %v2024_v31 = vld [vmem:[#allocation10 + $0x4c] sm:$0xf]  ;;  %v1892_v37 = vld [vmem:[#allocation10 + $0x30] sm:$0xf] }
  0x90   : > { %700 = vmatpush.msrb.mxu0 %v680_v51  ;;  %663 = vmatmul.bf16.vlgmr.msra.gmra.mxu3 %v2710_v52  ;;  %v1905_v32 = vor.u32 %v2025_v30, %v1904_v29  ;;  %v2022_v38 = vld [vmem:[#allocation10 + $0x38] sm:$0xf0]  ;;  %v2021_v39 = vld [vmem:[#allocation10 + $0x34] sm:$0xf]  ;;  %v1880_v46 = vld [vmem:[#allocation10 + $0x18] sm:$0xf] }
  0x91   : > { %878 = vmatpush.msrb.mxu3 %v680_v51  ;;  %631 = vmatpush.bf16.msra.mxu1 %v1731_v34  ;;  %v2019_v47 = vld [vmem:[#allocation10 + $0x20] sm:$0xf0]  ;;  %v2018_v48 = vld [vmem:[#allocation10 + $0x1c] sm:$0xf]  ;;  %v1900_v12 = vld [vmem:[#allocation10 + $0x38] sm:$0xf] }
  0x92   : > { %701 = vmatpush.msrb.mxu0 %v679_v53  ;;  %v1888_v16 = vld [vmem:[#allocation10 + $0x20] sm:$0xf]  ;;  %v2020_v17 = vld [vmem:[#allocation10 + $0x28] sm:$0xf0] }
  0x93   : > { %879 = vmatpush.msrb.mxu3 %v679_v53  ;;  %646 = vmatpush.bf16.msra.mxu2 %v1719_v36  ;;  %v2038_v36 = vld [vmem:[#allocation10 + $0xb8] sm:$0xf0] }
  0x94   : > { %702 = vmatpush.msrb.mxu0 %v678_v54 }
  0x95   : > { %880 = vmatpush.msrb.mxu3 %v678_v54  ;;  %632 = vmatpush.bf16.msra.mxu1 %v1715_v43 }
  0x96   : > { %703 = vmatpush.msrb.mxu0 %v677_v55 }
  0x97   : > { %881 = vmatpush.msrb.mxu3 %v677_v55  ;;  %647 = vmatpush.bf16.msra.mxu2 %v1703_v44 }
  0x98   : > { %704 = vmatpush.msrb.mxu0 %v676_v56 }
  0x99   : > { %882 = vmatpush.msrb.mxu3 %v676_v56  ;;  %633 = vmatpush.bf16.msra.mxu1 %v1699_v49 }
  0x9a   : > { %705 = vmatpush.msrb.mxu0 %v675_v57 }
  0x9b   : > { %883 = vmatpush.msrb.mxu3 %v675_v57  ;;  %648 = vmatpush.bf16.msra.mxu2 %v1687_v50  ;;  %v1948_v50 = vld [vmem:[#allocation10 + $0x98] sm:$0xf] }
  0x9c   : > { %901 = vmatpush.msra.mxu0 %v2739_v24 }
  0x9d   : > { %992 = vmatpush.msra.mxu3 %v680_v51 }
  0x9e   : > { %902 = vmatpush.msra.mxu0 %v2745_v27  ;;  %649 = vmatmul.bf16.vlgmr.msra.gmra.mxu2 %v2710_v52 }
  0x9f   : > { %993 = vmatpush.msra.mxu3 %v679_v53  ;;  %1804 = vmatmul.msk.f32.vlgmr.msrb.gmra.mxu0 %vm683_vm0, %v2715_v58 }
  0xa0   : > { %1844 = vmatmul.msk.f32.vlgmr.msrb.gmra.mxu3 %vm683_vm0, %v2718_v59  ;;  %903 = vmatpush.msra.mxu0 %v2750_v33 }
  0xa1   : > { %994 = vmatpush.msra.mxu3 %v678_v54 }
  0xa2   : > { %904 = vmatpush.msra.mxu0 %v2753_v35 }
  0xa3   : > { %995 = vmatpush.msra.mxu3 %v677_v55 }
  0xa4   : > { %905 = vmatpush.msra.mxu0 %v2756_v41 }
  0xa5   : > { %996 = vmatpush.msra.mxu3 %v676_v56 }
  0xa7   : > { %997 = vmatpush.msra.mxu3 %v675_v57  ;;  %1805 = vmatmul.msk.f32.gmra.mxu0 %vm683_vm0, %v2725_v60 }
  0xa8   : > { %1845 = vmatmul.msk.f32.gmra.mxu3 %vm683_vm0, %v2728_v61 }
  0xa9   : > { %1106 = vmatpush.msrb.mxu3 %v680_v51  ;;  %v1975_v51 = vld [vmem:[#allocation7 + $0x4] sm:$0xf] }
  0xab   : > { %1107 = vmatpush.msrb.mxu3 %v679_v53  ;;  %v1680_v53 = vld [vmem:[#allocation7 + $0x10] sm:$0xf0] }
  0xad   : > { %1108 = vmatpush.msrb.mxu3 %v678_v54  ;;  %v2764_v54 = vld [vmem:[#allocation11 + $0x38] sm:$0xff] }
  0xae   : > { %803 = vmatpush.bf16.msrb.mxu2 %v2764_v54 }
  0xaf   : > { %1109 = vmatpush.msrb.mxu3 %v677_v55  ;;  %v2767_v55 = vld [vmem:[%s2688_s12 + $0x38] sm:$0xff] }
  0xb0   : > { %1852 = vmatmul.msk.f32.vlgmr.msra.gmra.mxu3 %vm683_vm0, %v2735_v11 }
  0xb1   : > { %1110 = vmatpush.msrb.mxu3 %v676_v56  ;;  %v1683_v56 = vor.u32 %v1975_v51, %v1680_v53  ;;  %v2035_v51 = vld [vmem:[#allocation10 + $0xa0] sm:$0xf0]  ;;  %v1881_v53 = vor.u32 %v2019_v47, %v1880_v46 }
  0xb3   : > { %1111 = vmatpush.msrb.mxu3 %v675_v57  ;;  %v2772_v57 = vld [vmem:[#allocation11 + $0x30] sm:$0xff]  ;;  %634 = vmatpush.bf16.msra.mxu1 %v1683_v56  ;;  %v1949_v56 = vor.u32 %v2035_v51, %v1948_v50 }
  0xb4   : > { %804 = vmatpush.bf16.msrb.mxu2 %v2772_v57 }
  0xb6   : > { %635 = vmatmul.bf16.vlgmr.msra.gmra.mxu1 %v2710_v52  ;;  %v669_v52 = vld [vmem:[#allocation13] sm:$0xff] }
  0xb7   : > { %723 = vmatpush.msrb.mxu1 %v2739_v24  ;;  %906 = vmatpush.msra.mxu0 %v669_v52 }
  0xb8   : > { %1853 = vmatmul.msk.f32.gmra.mxu3 %vm683_vm0, %v2742_v25  ;;  %805 = vmatpush.bf16.msrb.mxu2 %v2777_v62 }
  0xb9   : > { %724 = vmatpush.msrb.mxu1 %v2745_v27  ;;  %1015 = vmatpush.msrb.mxu0 %v2739_v24 }
  0xba   : > { %1846 = vmatmul.msk.f32.vlgmr.msra.gmra.mxu0 %vm683_vm0, %v2718_v59  ;;  %v1952_v59 = vld [vmem:[#allocation10 + $0xa8] sm:$0xf] }
  0xbb   : > { %725 = vmatpush.msrb.mxu1 %v2750_v33  ;;  %1016 = vmatpush.msrb.mxu0 %v2745_v27 }
  0xbc   : > { %806 = vmatpush.bf16.msrb.mxu2 %v2783_v63 }
  0xbd   : > { %726 = vmatpush.msrb.mxu1 %v2753_v35  ;;  %1017 = vmatpush.msrb.mxu0 %v2750_v33 }
  0xbf   : > { %727 = vmatpush.msrb.mxu1 %v2756_v41  ;;  %1018 = vmatpush.msrb.mxu0 %v2753_v35 }
  0xc0   : > { %1860 = vmatmul.msk.f32.vlgmr.msrb.gmra.mxu3 %vm683_vm0, %v2759_v42  ;;  %807 = vmatpush.bf16.msrb.mxu2 %v2788_v0 }
  0xc1   : > { %728 = vmatpush.msrb.mxu1 %v669_v52  ;;  %1019 = vmatpush.msrb.mxu0 %v2756_v41 }
  0xc2   : > { %1847 = vmatmul.msk.f32.gmra.mxu0 %vm683_vm0, %v2728_v61  ;;  %v2036_v61 = vld [vmem:[#allocation10 + $0xac] sm:$0xf] }
  0xc3   : > { %917 = vmatpush.bf16.msra.mxu1 %v2764_v54  ;;  %1020 = vmatpush.msrb.mxu0 %v669_v52  ;;  %v1957_v6 = vor.u32 %v2036_v61, %v1954_v5  ;;  %v1924_v5 = vld [vmem:[#allocation10 + $0x68] sm:$0xf] }
  0xc4   : > { %808 = vmatpush.bf16.msrb.mxu2 %v2791_v1 }
  0xc5   : > { %1129 = vmatpush.msra.mxu0 %v2739_v24 }
  0xc6   : > { %1806 = vmatmul.msk.f32.vlgmr.msrb.gmra.mxu1 %vm683_vm0, %v2715_v58 }
  0xc7   : > { %918 = vmatpush.bf16.msra.mxu1 %v2772_v57  ;;  %1130 = vmatpush.msra.mxu0 %v2745_v27 }
  0xc8   : > { %1861 = vmatmul.msk.f32.gmra.mxu3 %vm683_vm0, %v2767_v55  ;;  %809 = vmatpush.bf16.msrb.mxu2 %v2794_v2 }
  0xc9   : > { %1131 = vmatpush.msra.mxu0 %v2750_v33  ;;  %v1906_v33 = vld [vmem:[#allocation10 + $0x54] sm:$0xf0] }
  0xca   : > { %1854 = vmatmul.msk.f32.vlgmr.msrb.gmra.mxu0 %vm683_vm0, %v2735_v11  ;;  %v1941_v11 = vor.u32 %v2034_v8, %v1940_v7  ;;  %v1909_v34 = vor.u32 %v2024_v31, %v1906_v33  ;;  %v1912_v7 = vld [vmem:[#allocation10 + $0x50] sm:$0xf]  ;;  %v2026_v8 = vld [vmem:[#allocation10 + $0x58] sm:$0xf0] }
  0xcb   : > { %919 = vmatpush.bf16.msra.mxu1 %v2777_v62  ;;  %1132 = vmatpush.msra.mxu0 %v2753_v35  ;;  %v1960_v35 = vld [vmem:[#allocation10 + $0xb0] sm:$0xf] }
  0xcc   : > { %810 = vmatpush.bf16.msrb.mxu2 %v2801_v3  ;;  %v1961_v44 = vor.u32 %v2038_v36, %v1960_v35 }
  0xcd   : > { %1133 = vmatpush.msra.mxu0 %v2756_v41  ;;  %v1893_v41 = vor.u32 %v2022_v38, %v1892_v37 }
  0xce   : > { %1807 = vmatmul.msk.f32.gmra.mxu1 %vm683_vm0, %v2725_v60  ;;  %v2037_v60 = vld [vmem:[#allocation10 + $0xb0] sm:$0xf0] }
  0xcf   : > { %920 = vmatpush.bf16.msra.mxu1 %v2783_v63  ;;  %1134 = vmatpush.msra.mxu0 %v669_v52  ;;  %v1953_v4 = vor.u32 %v2037_v60, %v1952_v59  ;;  %v1870_v59 = vld [vmem:[#allocation10 + $0xc] sm:$0xf0] }
  0xd0   : > { %1031 = vmatpush.bf16.msra.mxu2 %v2764_v54 }
  0xd1   : > { %1362 = vmatpush.bf16.msra.mxu3 %v1953_v4  ;;  %1376 = vmatpush.bf16.msrb.mxu0 %v1957_v6  ;;  %v2029_v6 = vld [vmem:[#allocation10 + $0x70] sm:$0xf0] }
  0xd2   : > { %1855 = vmatmul.msk.f32.gmra.mxu0 %vm683_vm0, %v2742_v25  ;;  %v1917_v25 = vor.u32 %v2028_v22, %v1916_v21  ;;  %v1876_v21 = vld [vmem:[#allocation10 + $0x8] sm:$0xf]  ;;  %v2017_v22 = vld [vmem:[#allocation10 + $0x10] sm:$0xf0] }
  0xd3   : > { %921 = vmatpush.bf16.msra.mxu1 %v2788_v0  ;;  %v1877_v23 = vor.u32 %v2017_v22, %v1876_v21 }
  0xd4   : > { %1032 = vmatpush.bf16.msra.mxu2 %v2772_v57 }
  0xd5   : > { %1363 = vmatpush.bf16.msra.mxu3 %v1941_v11  ;;  %1377 = vmatpush.bf16.msrb.mxu0 %v1945_v14  ;;  %v1913_v11 = vor.u32 %v2026_v8, %v1912_v7  ;;  %v2023_v14 = vld [vmem:[#allocation10 + $0x40] sm:$0xf0] }
  0xd6   : > { %v1901_v15 = vor.u32 %v2023_v14, %v1900_v12 }
  0xd7   : > { %922 = vmatpush.bf16.msra.mxu1 %v2791_v1 }
  0xd8   : > { %1033 = vmatpush.bf16.msra.mxu2 %v2777_v62 }
  0xd9   : > { %1364 = vmatpush.bf16.msra.mxu3 %v1929_v18  ;;  %1378 = vmatpush.bf16.msrb.mxu0 %v1933_v20  ;;  %v1889_v20 = vor.u32 %v2020_v17, %v1888_v16 }
  0xda   : > { %1862 = vmatmul.msk.f32.vlgmr.msra.gmra.mxu0 %vm683_vm0, %v2759_v42  ;;  %v1894_v42 = vld [vmem:[#allocation10 + $0x3c] sm:$0xf0] }
  0xdb   : > { %923 = vmatpush.bf16.msra.mxu1 %v2794_v2  ;;  %v1897_v45 = vor.u32 %v2021_v39, %v1894_v42 }
  0xdc   : > { %1034 = vmatpush.bf16.msra.mxu2 %v2783_v63 }
  0xdd   : > { %1365 = vmatpush.bf16.msra.mxu3 %v1917_v25  ;;  %1379 = vmatpush.bf16.msrb.mxu0 %v1921_v28 }
  0xdf   : > { %924 = vmatpush.bf16.msra.mxu1 %v2801_v3 }
  0xe0   : > { %1035 = vmatpush.bf16.msra.mxu2 %v2788_v0 }
  0xe1   : > { %1366 = vmatpush.bf16.msra.mxu3 %v1905_v32  ;;  %1380 = vmatpush.bf16.msrb.mxu0 %v1909_v34 }
  0xe2   : > { %1863 = vmatmul.msk.f32.gmra.mxu0 %vm683_vm0, %v2767_v55 }
  0xe3   : > { %1145 = vmatpush.bf16.msrb.mxu1 %v2764_v54  ;;  %v1882_v54 = vld [vmem:[#allocation10 + $0x24] sm:$0xf0] }
  0xe4   : > { %1036 = vmatpush.bf16.msra.mxu2 %v2791_v1  ;;  %v1885_v55 = vor.u32 %v2018_v48, %v1882_v54 }
  0xe5   : > { %1367 = vmatpush.bf16.msra.mxu3 %v1893_v41  ;;  %1381 = vmatpush.bf16.msrb.mxu0 %v1897_v45 }
  0xe7   : > { %1146 = vmatpush.bf16.msrb.mxu1 %v2772_v57  ;;  %v1936_v57 = vld [vmem:[#allocation10 + $0x80] sm:$0xf] }
  0xe8   : > { %1037 = vmatpush.bf16.msra.mxu2 %v2794_v2 }
  0xe9   : > { %1368 = vmatpush.bf16.msra.mxu3 %v1881_v53  ;;  %1382 = vmatpush.bf16.msrb.mxu0 %v1885_v55 }
  0xeb   : > { %1147 = vmatpush.bf16.msrb.mxu1 %v2777_v62  ;;  %v2032_v62 = vld [vmem:[#allocation10 + $0x88] sm:$0xf0] }
  0xec   : > { %1038 = vmatpush.bf16.msra.mxu2 %v2801_v3  ;;  %v1937_v61 = vor.u32 %v2032_v62, %v1936_v57 }
  0xef   : > { %1148 = vmatpush.bf16.msrb.mxu1 %v2783_v63  ;;  %v1868_v63 = vld [vmem:[#allocation10] sm:$0xf] }
  0xf3   : > { %1149 = vmatpush.bf16.msrb.mxu1 %v2788_v0  ;;  %v2016_v0 = vld [vmem:[#allocation10 + $0x8] sm:$0xf0] }
  0xf7   : > { %1150 = vmatpush.bf16.msrb.mxu1 %v2791_v1  ;;  %v2015_v1 = vld [vmem:[#allocation10 + $0x4] sm:$0xf] }
  0xf8   : > { %v1873_v4 = vor.u32 %v2015_v1, %v1870_v59 }
  0xfa   : > { %1383 = vmatpush.bf16.msrb.mxu0 %v1873_v4 }
  0xfb   : > { %1151 = vmatpush.bf16.msrb.mxu1 %v2794_v2  ;;  %v1869_v2 = vor.u32 %v2016_v0, %v1868_v63 }
  0xfd   : > { %1369 = vmatpush.bf16.msra.mxu3 %v1869_v2 }
  0xff   : > { %1152 = vmatpush.bf16.msrb.mxu1 %v2801_v3  ;;  %v1925_v3 = vor.u32 %v2029_v6, %v1924_v5 }
 0x10c   : > { %v2836_v58 = vpop.f32.mrf.mxu0 }
 0x113   : > { %v2842_v10 = vpop.f32.mrf.mxu3 }
 0x114   : > { %v2846_v13 = vpop.f32.mrf.mxu0 }
 0x11b   : > { %v2850_v24 = vpop.f32.mrf.mxu3 }
 0x11c   : > { %v2854_v27 = vpop.f32.mrf.mxu0 }
 0x121   : > { %v2874_v39 = vpop.f32.mrf.mxu2 }
 0x123   : > { %v2858_v40 = vpop.f32.mrf.mxu3 }
 0x124   : > { %v2860_v43 = vpop.f32.mrf.mxu0  ;;  %v914_v26 = vadd.f32 %v2858_v40, %v2854_v27 }
 0x125   : > { %v738_v49 = vpack.c.bf16 %v2860_v43, %v2854_v27 }
 0x127   : > { %811 = vmatmul.bf16.vlgmr.msrb.gmra.mxu2 %v738_v49 }
 0x128   : > { %1390 = vmatpush.bf16.msrb.mxu2 %v1961_v44 }
 0x129   : > { %v2880_v41 = vpop.f32.mrf.mxu2 }
 0x12b   : > { %v888_v52 = vpop.f32.mrf.mxu3 }
 0x12c   : > { %v916_v60 = vpack.c.bf16 %v888_v52, %v2858_v40  ;;  %1391 = vmatpush.bf16.msrb.mxu2 %v1949_v56  ;;  %v915_v28 = vadd.f32 %v888_v52, %v2860_v43  ;;  %v2884_v43 = vld [vmem:[#allocation8] sm:$0xf] }
 0x12d   : > { %v448_v44 = vperm.slane %v2884_v43, 3  ;;  %v445_v12 = vperm.slane %v2884_v43, 0  ;;  %v446_v14 = vperm.slane %v2884_v43, 1 }
 0x12e   : > { %925 = vmatmul.bf16.vlgmr.msra.gmra.mxu1 %v916_v60 }
 0x12f   : > { %v2890_v46 = vadd.f32 %v2842_v10, %v448_v44  ;;  %v2897_v55 = vadd.f32 %v2850_v24, %v448_v44  ;;  %v623_v21 = vadd.f32 %v2836_v58, %v445_v12 }
 0x130   : > { %1392 = vmatpush.bf16.msrb.mxu2 %v1937_v61 }
 0x133   : > { %v999_v9 = vpop.f32.mrf.mxu3  ;;  %v636_v36 = vpop.f32.mrf.mxu1 }
 0x134   : > { %1393 = vmatpush.bf16.msrb.mxu2 %v1925_v3  ;;  %v1028_v29 = vadd.f32 %v999_v9, %v914_v26  ;;  %v637_v22 = vadd.f32 %v636_v36, %v446_v14 }
 0x137   : > { %v2872_v38 = vpop.f32.mrf.mxu0 }
 0x138   : > { %1394 = vmatpush.bf16.msrb.mxu2 %v1913_v11 }
 0x13b   : > { %v1002_v18 = vpop.f32.mrf.mxu3  ;;  %v2870_v37 = vpop.f32.mrf.mxu1 }
 0x13c   : > { %v1030_v19 = vpack.c.bf16 %v1002_v18, %v999_v9  ;;  %1395 = vmatpush.bf16.msrb.mxu2 %v1901_v15  ;;  %v1029_v30 = vadd.f32 %v1002_v18, %v915_v28 }
 0x13e   : > { %1039 = vmatmul.bf16.vlgmr.msra.gmra.mxu2 %v1030_v19 }
 0x13f   : > { %v2878_v40 = vpop.f32.mrf.mxu0 }
 0x140   : > { %1396 = vmatpush.bf16.msrb.mxu2 %v1889_v20 }
 0x143   : > { %v1113_v25 = vpop.f32.mrf.mxu3  ;;  %v2876_v27 = vpop.f32.mrf.mxu1 }
 0x144   : > { %1397 = vmatpush.bf16.msrb.mxu2 %v1877_v23  ;;  %v1142_v32 = vadd.f32 %v1113_v25, %v1028_v29 }
 0x147   : > { %v2887_v45 = vpop.f32.mrf.mxu0 }
 0x14b   : > { %v1116_v31 = vpop.f32.mrf.mxu3  ;;  %v2882_v42 = vpop.f32.mrf.mxu1 }
 0x14c   : > { %v1143_v33 = vadd.f32 %v1116_v31, %v1029_v30  ;;  %v1144_v34 = vpack.c.bf16 %v1116_v31, %v1113_v25 }
 0x14e   : > { %v1201_v35 = vpack.c.bf16 %v1143_v33, %v1142_v32  ;;  %1153 = vmatmul.bf16.vlgmr.msrb.gmra.mxu1 %v1144_v34 }
 0x14f   : > { %v2894_v54 = vpop.f32.mrf.mxu0 }
 0x150   : > { %1370 = vmatmul.bf16.vlgmr.msra.gmra.mxu3 %v1201_v35  ;;  %1384 = vmatmul.bf16.vlgmr.msrb.gmra.mxu0 %v1201_v35 }
 0x151   : > { %1398 = vmatmul.bf16.vlgmr.msrb.gmra.mxu2 %v1201_v35 }
 0x157   : > { %v2906_v60 = vpop.f32.mrf.mxu0 }
 0x15f   : > { %v2919_v11 = vpop.f32.mrf.mxu0 }
 0x1aa   : > { %v812_v47 = vpop.f32.mrf.mxu2 }
 0x1ab   : > { %v813_v48 = vadd.f32 %v812_v47, %v2890_v46  ;;  %v926_v49 = vpop.f32.mrf.mxu1 }
 0x1ac   : > { %v927_v50 = vadd.f32 %v926_v49, %v2890_v46 }
 0x1ad   : > { %v1840_v51 = vmul.f32 -1.442695, %v813_v48 }
 0x1ae   : > { %v1848_v53 = vmul.f32 -1.442695, %v927_v50 }
 0x1af   : > { %2149 = vpow2.f32 %v1840_v51 }
 0x1b0   : > { %2151 = vpow2.f32 %v1848_v53 }
 0x1b2   : > { %v814_v56 = vpop.f32.mrf.mxu2 }
 0x1b3   : > { %v815_v57 = vadd.f32 %v814_v56, %v2897_v55  ;;  %v928_v10 = vpop.f32.mrf.mxu1 }
 0x1b4   : > { %v929_v62 = vadd.f32 %v928_v10, %v2897_v55 }
 0x1b5   : > { %v2150_v63 = vpop.eup %2149  ;;  %v1841_v0 = vmul.f32 -1.442695, %v815_v57 }
 0x1b6   : > { %v2152_v1 = vpop.eup %2151  ;;  %v2901_v52 = vadd.f32 1.0, %v2150_v63  ;;  %v1849_v2 = vmul.f32 -1.442695, %v929_v62 }
 0x1b7   : > { %v2903_v59 = vadd.f32 1.0, %v2152_v1  ;;  %2153 = vpow2.f32 %v1841_v0 }
 0x1b8   : > { %2155 = vrcp.f32 %v2901_v52  ;;  %v836_v26 = vand.u32 2147483648, %v2901_v52  ;;  %vm830_vm3 = vweird.f32 %v2901_v52 }
 0x1b9   : > { %2157 = vpow2.f32 %v1849_v2  ;;  %vm944_vm13 = vweird.f32 %v2903_v59 }
 0x1ba   : > { %2159 = vrcp.f32 %v2903_v59 }
 0x1bd   : > { %v2154_v24 = vpop.eup %2153 }
 0x1be   : > { %v824_v61 = vadd.f32 1.0, %v2154_v24  ;;  %v2909_v4 = vpop.eup %2155 }
 0x1bf   : > { %v2158_v5 = vpop.eup %2157  ;;  %v826_v9 = vmul.f32 %v2909_v4, %v2901_v52  ;;  %vm831_vm1 = vweird.f32 %v2909_v4 }
 0x1c0   : > { %2161 = vrcp.f32 %v824_v61  ;;  %v2911_v6 = vpop.eup %2159  ;;  %v2913_v3 = vadd.f32 1.0, %v2158_v5  ;;  %v851_v20 = vand.u32 2147483648, %v824_v61  ;;  %vm845_vm4 = vweird.f32 %v824_v61  ;;  %vm2955_vm12 = vmor %vm830_vm3, %vm831_vm1 }
 0x1c1   : > { %v1040_v7 = vpop.f32.mrf.mxu2  ;;  %v940_v15 = vmul.f32 %v2911_v6, %v2903_v59  ;;  %v827_v18 = vsub.f32 1.0, %v826_v9  ;;  %vm945_vm2 = vweird.f32 %v2911_v6  ;;  %v849_v30 = vand.u32 2147483647, %v824_v61 }
 0x1c2   : > { %v1041_v8 = vadd.f32 %v1040_v7, %v2890_v46  ;;  %2163 = vrcp.f32 %v2913_v3  ;;  %v852_v34 = vor.u32 1.1754944e-38, %v851_v20  ;;  %v963_v51 = vand.u32 2147483647, %v2913_v3  ;;  %vm2964_vm14 = vmor %vm944_vm13, %vm945_vm2 }
 0x1c3   : > { %v941_v23 = vsub.f32 1.0, %v940_v15  ;;  %v828_v32 = vmul.f32 %v2909_v4, %v827_v18  ;;  %v965_v53 = vand.u32 2147483648, %v2913_v3  ;;  %vm850_vm8 = vcmp.eq.f32.partialorder %v849_v30, 8.507059e+37 }
 0x1c4   : > { %v1856_v16 = vmul.f32 -1.442695, %v1041_v8  ;;  %vm959_vm9 = vweird.f32 %v2913_v3  ;;  %v950_v7 = vand.u32 2147483648, %v2903_v59  ;;  %vm964_vm11 = vcmp.eq.f32.partialorder %v963_v51, 8.507059e+37 }
 0x1c5   : > { %v942_v36 = vmul.f32 %v2911_v6, %v941_v23  ;;  %v829_v0 = vadd.f32 %v2909_v4, %v828_v32  ;;  %v834_v15 = vand.u32 2147483647, %v2901_v52 }
 0x1c6   : > { %v2162_v17 = vpop.eup %2161  ;;  %2165 = vpow2.f32 %v1856_v16  ;;  %v948_v16 = vand.u32 2147483647, %v2903_v59  ;;  %v951_v30 = vor.u32 1.1754944e-38, %v950_v7 }
 0x1c7   : > { %v841_v19 = vmul.f32 %v2162_v17, %v824_v61  ;;  %vm846_vm5 = vweird.f32 %v2162_v17  ;;  %v943_v24 = vadd.f32 %v2911_v6, %v942_v36  ;;  %v966_v61 = vor.u32 1.1754944e-38, %v965_v53 }
 0x1c8   : > { %v2164_v25 = vpop.eup %2163  ;;  %vm847_vm7 = vmor %vm845_vm4, %vm846_vm5  ;;  %v833_v59 = vsel %vm2955_vm12, %v2909_v4, %v829_v0  ;;  %vm835_vm15 = vcmp.eq.f32.partialorder %v834_v15, 8.507059e+37  ;;  %vm949_vm0 = vcmp.eq.f32.partialorder %v948_v16, 8.507059e+37  ;;  %v625_v53 = vadd.f32 %v2846_v13, %v445_v12 }
 0x1c9   : > { %v842_v28 = vsub.f32 1.0, %v841_v19  ;;  %v1042_v29 = vpop.f32.mrf.mxu2  ;;  %v955_v31 = vmul.f32 %v2164_v25, %v2913_v3  ;;  %vm960_vm6 = vweird.f32 %v2164_v25 }
 0x1ca   : > { %v1043_v58 = vadd.f32 %v1042_v29, %v2897_v55  ;;  %vm961_vm10 = vmor %vm959_vm9, %vm960_vm6 }
 0x1cb   : > { %v843_v33 = vmul.f32 %v2162_v17, %v842_v28  ;;  %v1154_v35 = vpop.f32.mrf.mxu1  ;;  %v956_v44 = vsub.f32 1.0, %v955_v31  ;;  %v947_v28 = vsel %vm2964_vm14, %v2911_v6, %v943_v24 }
 0x1cc   : > { %v1857_v47 = vmul.f32 -1.442695, %v1043_v58  ;;  %v1155_v48 = vadd.f32 %v1154_v35, %v2890_v46  ;;  %v2166_v49 = vpop.eup %2165  ;;  %v952_v6 = vsel %vm949_vm0, %v951_v30, %v947_v28 }
 0x1cd   : > { %v844_v50 = vadd.f32 %v2162_v17, %v843_v33  ;;  %v1385_v56 = vpop.f32.mrf.mxu0  ;;  %v957_v57 = vmul.f32 %v2164_v25, %v956_v44  ;;  %v2942_v10 = vadd.f32 1.0, %v2166_v49  ;;  %v969_v44 = vmul.f32 %v952_v6, %v2872_v38 }
 0x1ce   : > { %2167 = vpow2.f32 %v1857_v47  ;;  %v1864_v62 = vmul.f32 -1.442695, %v1155_v48  ;;  %v1405_v46 = vadd.f32 %v1385_v56, %v637_v22  ;;  %v837_v22 = vor.u32 1.1754944e-38, %v836_v26 }
 0x1cf   : > { %v848_v63 = vsel %vm847_vm7, %v2162_v17, %v844_v50  ;;  %v958_v2 = vadd.f32 %v2164_v25, %v957_v57  ;;  %2169 = vrcp.f32 %v2942_v10  ;;  %v639_v49 = vadd.f32 %v2870_v37, %v446_v14 }
 0x1d0   : > { %v853_v1 = vsel %vm850_vm8, %v852_v34, %v848_v63  ;;  %2171 = vpow2.f32 %v1864_v62  ;;  %v1964_v5 = vmul.f32 -1.442695, %v1405_v46  ;;  %v838_v4 = vsel %vm835_vm15, %v837_v22, %v833_v59 }
 0x1d1   : > { %v962_v8 = vsel %vm961_vm10, %v2164_v25, %v958_v2  ;;  %v856_v3 = vmul.f32 %v853_v1, %v2882_v42  ;;  %v447_v34 = vperm.slane %v2884_v43, 2  ;;  %v855_v36 = vmul.f32 %v838_v4, %v2876_v27 }
 0x1d2   : > { %v967_v17 = vsel %vm964_vm11, %v966_v61, %v962_v8  ;;  %2173 = vpow2.f32 %v1964_v5  ;;  %vm1058_vm1 = vweird.f32 %v2942_v10  ;;  %v1062_v13 = vand.u32 2147483647, %v2942_v10 }
 0x1d3   : > { %v1156_v18 = vpop.f32.mrf.mxu1  ;;  %v1371_v19 = vpop.f32.mrf.mxu3  ;;  %v970_v52 = vmul.f32 %v967_v17, %v2878_v40  ;;  %v651_v27 = vadd.f32 %v2874_v39, %v447_v34  ;;  %v3010_v14 = vadd.f32 %v969_v44, %v855_v36  ;;  %v1064_v12 = vand.u32 2147483648, %v2942_v10 }
 0x1d4   : > { %v2168_v20 = vpop.eup %2167  ;;  %v1157_v23 = vadd.f32 %v1156_v18, %v2897_v55  ;;  %v1404_v25 = vadd.f32 %v1371_v19, %v623_v21  ;;  %v1399_v2 = vpop.f32.mrf.mxu2  ;;  %vm1063_vm6 = vcmp.eq.f32.partialorder %v1062_v13, 8.507059e+37 }
 0x1d5   : > { %v2976_v26 = vadd.f32 1.0, %v2168_v20  ;;  %v2978_v29 = vpop.eup %2169  ;;  %v2980_v55 = vadd.f32 %v970_v52, %v856_v3  ;;  %v1387_v47 = vpop.f32.mrf.mxu0  ;;  %v1406_v16 = vadd.f32 %v1399_v2, %v651_v27  ;;  %v1065_v22 = vor.u32 1.1754944e-38, %v1064_v12 }
 0x1d6   : > { %v1865_v31 = vmul.f32 -1.442695, %v1157_v23  ;;  %v1962_v58 = vmul.f32 -1.442695, %v1404_v25  ;;  %v2172_v21 = vpop.eup %2171  ;;  %v1054_v40 = vmul.f32 %v2978_v29, %v2942_v10  ;;  %v1408_v62 = vadd.f32 %v1387_v47, %v639_v49 }
 0x1d7   : > { %2175 = vrcp.f32 %v2976_v26  ;;  %v2985_v32 = vadd.f32 1.0, %v2172_v21  ;;  %vm1059_vm2 = vweird.f32 %v2978_v29  ;;  %v1077_v5 = vand.u32 2147483647, %v2976_v26 }
 0x1d8   : > { %2177 = vpow2.f32 %v1865_v31  ;;  %v1055_v33 = vsub.f32 1.0, %v1054_v40  ;;  %v2174_v35 = vpop.eup %2173  ;;  %v1079_v7 = vand.u32 2147483648, %v2976_v26  ;;  %v1965_v3 = vmul.f32 -1.442695, %v1408_v62  ;;  %vm3031_vm4 = vmor %vm1058_vm1, %vm1059_vm2 }
 0x1d9   : > { %2179 = vpow2.f32 %v1962_v58  ;;  %v3005_v56 = vadd.f32 1.0, %v2174_v35  ;;  %vm1073_vm5 = vweird.f32 %v2976_v26  ;;  %v1176_v20 = vand.u32 2147483647, %v2985_v32 }
 0x1da   : > { %2181 = vrcp.f32 %v2985_v32  ;;  %v1056_v50 = vmul.f32 %v2978_v29, %v1055_v33  ;;  %v1178_v10 = vand.u32 2147483648, %v2985_v32  ;;  %vm3049_vm8 = vcmp.eq.f32.partialorder %v1077_v5, 8.507059e+37 }
 0x1db   : > { %v1373_v24 = vpop.f32.mrf.mxu3  ;;  %v1080_v59 = vor.u32 1.1754944e-38, %v1079_v7  ;;  %vm1172_vm10 = vweird.f32 %v2985_v32  ;;  %vm3066_vm12 = vcmp.eq.f32.partialorder %v1176_v20, 8.507059e+37 }
 0x1dc   : > { %v1057_v0 = vadd.f32 %v2978_v29, %v1056_v50  ;;  %v1407_v17 = vadd.f32 %v1373_v24, %v625_v53  ;;  %v1179_v4 = vor.u32 1.1754944e-38, %v1178_v10 }
 0x1dd   : > { %v2991_v48 = vpop.eup %2175 }
 0x1de   : > { %v2178_v51 = vpop.eup %2177  ;;  %v1069_v38 = vmul.f32 %v2991_v48, %v2976_v26  ;;  %vm1074_vm3 = vweird.f32 %v2991_v48  ;;  %v1061_v18 = vsel %vm3031_vm4, %v2978_v29, %v1057_v0  ;;  %v1963_v31 = vmul.f32 -1.442695, %v1407_v17 }
 0x1df   : > { %v2180_v57 = vpop.eup %2179  ;;  %v3008_v37 = vadd.f32 1.0, %v2178_v51  ;;  %vm3045_vm7 = vmor %vm1073_vm5, %vm1074_vm3  ;;  %v1066_v30 = vsel %vm1063_vm6, %v1065_v22, %v1061_v18  ;;  %v653_v18 = vadd.f32 %v2880_v41, %v447_v34  ;;  %vm1461_vm6 = vweird.f32 %v3005_v56 }
 0x1e0   : > { %v3012_v63 = vpop.eup %2181  ;;  %v1070_v39 = vsub.f32 1.0, %v1069_v38  ;;  %v3016_v46 = vadd.f32 1.0, %v2180_v57 }
 0x1e1   : > { %v1168_v1 = vmul.f32 %v3012_v63, %v2985_v32  ;;  %2183 = vrcp.f32 %v3008_v37  ;;  %vm1173_vm9 = vweird.f32 %v3012_v63  ;;  %vm1187_vm13 = vweird.f32 %v3008_v37 }
 0x1e2   : > { %v1071_v61 = vmul.f32 %v2991_v48, %v1070_v39  ;;  %2185 = vrcp.f32 %v3005_v56  ;;  %vm3062_vm11 = vmor %vm1172_vm10, %vm1173_vm9  ;;  %v1191_v44 = vand.u32 2147483647, %v3008_v37  ;;  %v1193_v47 = vand.u32 2147483648, %v3008_v37 }
 0x1e3   : > { %v1169_v8 = vsub.f32 1.0, %v1168_v1  ;;  %2187 = vrcp.f32 %v3016_v46  ;;  %vm1423_vm15 = vweird.f32 %v3016_v46  ;;  %v1429_v27 = vand.u32 2147483648, %v3016_v46 }
 0x1e4   : > { %v1072_v15 = vadd.f32 %v2991_v48, %v1071_v61  ;;  %2189 = vpow2.f32 %v1965_v3  ;;  %vm1192_vm2 = vcmp.eq.f32.partialorder %v1191_v44, 8.507059e+37  ;;  %v1194_v12 = vor.u32 1.1754944e-38, %v1193_v47 }
 0x1e5   : > { %v1170_v19 = vmul.f32 %v3012_v63, %v1169_v8  ;;  %2191 = vtanh.f32 %v1406_v16  ;;  %v1430_v24 = vor.u32 1.1754944e-38, %v1429_v27 }
 0x1e6   : > { %v1076_v52 = vsel %vm3045_vm7, %v2991_v48, %v1072_v15  ;;  %v1083_v48 = vmul.f32 %v1066_v30, %v2887_v45  ;;  %2193 = vpow2.f32 %v1963_v31 }
 0x1e7   : > { %v2184_v25 = vpop.eup %2183  ;;  %v1171_v28 = vadd.f32 %v3012_v63, %v1170_v19  ;;  %v1081_v35 = vsel %vm3049_vm8, %v1080_v59, %v1076_v52  ;;  %v1465_v19 = vand.u32 2147483647, %v3005_v56 }
 0x1e8   : > { %v3058_v26 = vpop.eup %2185  ;;  %v1183_v29 = vmul.f32 %v2184_v25, %v3008_v37  ;;  %vm1188_vm14 = vweird.f32 %v2184_v25  ;;  %v1084_v38 = vmul.f32 %v1081_v35, %v2894_v54  ;;  %v1085_v37 = vadd.f32 %v1083_v48, %v3010_v14 }
 0x1e9   : > { %v2188_v58 = vpop.eup %2187  ;;  %v1175_v33 = vsel %vm3062_vm11, %v3012_v63, %v1171_v28  ;;  %v1457_v36 = vmul.f32 %v3058_v26, %v3005_v56  ;;  %v1427_v63 = vand.u32 2147483647, %v3016_v46  ;;  %vm1189_vm1 = vmor %vm1187_vm13, %vm1188_vm14  ;;  %vm1462_vm5 = vweird.f32 %v3058_v26 }
 0x1ea   : > { %v1184_v6 = vsub.f32 1.0, %v1183_v29  ;;  %v1419_v32 = vmul.f32 %v2188_v58, %v3016_v46  ;;  %v2190_v51 = vpop.eup %2189  ;;  %v1180_v53 = vsel %vm3066_vm12, %v1179_v4, %v1175_v33  ;;  %vm1424_vm0 = vweird.f32 %v2188_v58  ;;  %vm1463_vm7 = vmor %vm1461_vm6, %vm1462_vm5 }
 0x1eb   : > { %v2192_v45 = vpop.eup %2191  ;;  %v1458_v13 = vsub.f32 1.0, %v1457_v36  ;;  %v1086_v39 = vadd.f32 %v1084_v38, %v2980_v55  ;;  %v1197_v0 = vmul.f32 %v1180_v53, %v2906_v60  ;;  %v3092_v2 = vadd.f32 1.0, %v2190_v51  ;;  %vm1425_vm3 = vmor %vm1423_vm15, %vm1424_vm0 }
 0x1ec   : > { %v1185_v49 = vmul.f32 %v2184_v25, %v1184_v6  ;;  %v1420_v50 = vsub.f32 1.0, %v1419_v32  ;;  %v2194_v5 = vpop.eup %2193  ;;  %vm1428_vm4 = vcmp.eq.f32.partialorder %v1427_v63, 8.507059e+37  ;;  %v1467_v14 = vand.u32 2147483648, %v3005_v56 }
 0x1ed   : > { %v1459_v60 = vmul.f32 %v3058_v26, %v1458_v13  ;;  %v1417_v3 = vadd.f32 1.0, %v2194_v5  ;;  %v1199_v9 = vadd.f32 %v1197_v0, %v1085_v37  ;;  %2195 = vrcp.f32 %v3092_v2 }
 0x1ee   : > { %v1186_v57 = vadd.f32 %v2184_v25, %v1185_v49  ;;  %v1421_v62 = vmul.f32 %v2188_v58, %v1420_v50  ;;  %v1468_v23 = vor.u32 1.1754944e-38, %v1467_v14  ;;  %vm1466_vm8 = vcmp.eq.f32.partialorder %v1465_v19, 8.507059e+37 }
 0x1ef   : > { %2197 = vrcp.f32 %v1417_v3  ;;  %v1460_v17 = vadd.f32 %v3058_v26, %v1459_v60  ;;  %v1444_v34 = vand.u32 2147483648, %v1417_v3  ;;  %v1442_v56 = vand.u32 2147483647, %v1417_v3 }
 0x1f0   : > { %v1422_v1 = vadd.f32 %v2188_v58, %v1421_v62  ;;  %v1190_v54 = vsel %vm1189_vm1, %v2184_v25, %v1186_v57  ;;  %vm1438_vm10 = vweird.f32 %v1417_v3  ;;  %v1482_v35 = vand.u32 2147483648, %v3092_v2 }
 0x1f1   : > { %v1195_v61 = vsel %vm1192_vm2, %v1194_v12, %v1190_v54  ;;  %v1464_v22 = vsel %vm1463_vm7, %v3058_v26, %v1460_v17  ;;  %v1445_v31 = vor.u32 1.1754944e-38, %v1444_v34  ;;  %vm1443_vm12 = vcmp.eq.f32.partialorder %v1442_v56, 8.507059e+37 }
 0x1f2   : > { %v1426_v7 = vsel %vm1425_vm3, %v2188_v58, %v1422_v1  ;;  %v1198_v8 = vmul.f32 %v1195_v61, %v2919_v11  ;;  %v1401_v11 = vpop.f32.mrf.mxu2  ;;  %v1469_v43 = vsel %vm1466_vm8, %v1468_v23, %v1464_v22  ;;  %vm1476_vm14 = vweird.f32 %v3092_v2 }
 0x1f3   : > { %v1431_v55 = vsel %vm1428_vm4, %v1430_v24, %v1426_v7  ;;  %v2196_v20 = vpop.eup %2195  ;;  %v1409_v42 = vadd.f32 %v1401_v11, %v653_v18  ;;  %v1480_v36 = vand.u32 2147483647, %v3092_v2  ;;  %v1483_v47 = vor.u32 1.1754944e-38, %v1482_v35 }
 0x1f4   : > { %v1488_v15 = vmul.f32 %v2192_v45, %v1431_v55  ;;  %v1200_v46 = vadd.f32 %v1198_v8, %v1086_v39  ;;  %v1472_v52 = vmul.f32 %v2196_v20, %v3092_v2  ;;  %vm1477_vm13 = vweird.f32 %v2196_v20 }
 0x1f5   : > { %v2198_v10 = vpop.eup %2197  ;;  %vm1478_vm15 = vmor %vm1476_vm14, %vm1477_vm13  ;;  %vm1481_vm0 = vcmp.eq.f32.partialorder %v1480_v36, 8.507059e+37 }
 0x1f6   : > { %v1490_v16 = vadd.f32 %v1488_v15, %v1199_v9  ;;  %v1434_v25 = vmul.f32 %v2198_v10, %v1417_v3  ;;  %vm1439_vm9 = vweird.f32 %v2198_v10  ;;  %v1473_v30 = vsub.f32 1.0, %v1472_v52 }
 0x1f7   : > { %vm1440_vm11 = vmor %vm1438_vm10, %vm1439_vm9 }
 0x1f8   : > { %2199 = vtanh.f32 %v1490_v16  ;;  %1498 = vst [vmem:[%s3106_s10] sm:$0xff] %v1490_v16  ;;  %v1435_v28 = vsub.f32 1.0, %v1434_v25  ;;  %v1474_v40 = vmul.f32 %v2196_v20, %v1473_v30 }
 0x1f9   : > { %2201 = vtanh.f32 %v1409_v42 }
 0x1fa   : > { %v1436_v29 = vmul.f32 %v2198_v10, %v1435_v28  ;;  %v1475_v33 = vadd.f32 %v2196_v20, %v1474_v40 }
 0x1fc   : > { %v1437_v26 = vadd.f32 %v2198_v10, %v1436_v29  ;;  %v1479_v44 = vsel %vm1478_vm15, %v2196_v20, %v1475_v33 }
 0x1fd   : > { %v1484_v49 = vsel %vm1481_vm0, %v1483_v47, %v1479_v44 }
 0x1fe   : > { %v2200_v59 = vpop.eup %2199  ;;  %v1441_v58 = vsel %vm1440_vm11, %v2198_v10, %v1437_v26 }
 0x1ff   : > { %v1494_v41 = vmul.f32 %v2200_v59, %v1469_v43  ;;  %v2202_v21 = vpop.eup %2201  ;;  %v1446_v4 = vsel %vm1443_vm12, %v1445_v31, %v1441_v58 }
 0x200   : > { %v1489_v6 = vmul.f32 %v2202_v21, %v1446_v4 }
 0x201   : > { %1501 = vst [vmem:[%s3118_s21] sm:$0xff] %v1494_v41 }
 0x202   : > { %v1491_v32 = vadd.f32 %v1489_v6, %v1200_v46 }
 0x204   : > { %2203 = vtanh.f32 %v1491_v32  ;;  %1499 = vst [vmem:[%s3106_s10 + $0x8] sm:$0xff] %v1491_v32 }
 0x205   : > { %2060 = dma.vmem_to_hbm [thread:$0]  (%p2096_p1), %s1509_s30, 768, %s1511_s13, [#allocation4], %s2515_s8, %s2515_s8, %s2516_s23  }
 0x20a   : > { %v2204_v48 = vpop.eup %2203 }
 0x20b   : > { %v1495_v50 = vmul.f32 %v2204_v48, %v1484_v49 }
 0x20d   : > { %1502 = vst [vmem:[%s3118_s21 + $0x8] sm:$0xff] %v1495_v50 }
 0x20e   : > { %2062 = dma.vmem_to_hbm [thread:$0]  (%p2096_p1), %s1523_s9, 768, %s1525_s2, [#allocation15], %s2515_s8, %s2515_s8, %s2516_s23  }
 0x20f   : > { %2478 = dma.done.wait (%p2096_p1), [#allocation4], 768  }
 0x210   : > { %2480 = vsyncadd (%p2096_p1), [#allocation4], 4294966528 }
 0x211   : > { %2482 = dma.done.wait (%p2096_p1), [#allocation15], 768  }
 0x212   : > { %2484 = vsyncadd (%p2096_p1), [#allocation15], 4294966528 }
 0x213 PF: > { %p25_p4 = scmp.ge.s32.totalorder %s2623_s19, 5   ;;  %s3192_s24 = smov %s2491_s25 }
 0x214   : > { %s3193_s25 = smov %s2495_s26  ;;  %s3194_s26 = smov %s2632_s22 }
 0x215   : > { %s3195_s27 = smov %s2623_s19  ;;  %27 = sbr.rel (!%p25_p4) target bundleno = 14 (0xe), region = 127 }
 0x21a   :  { %1546 = vsyncpa [#allocation3], 1 }
 0x21b   :  { %1548 = vsyncpa [#allocation3 + $0x1], 1 }
 0x21c   :  { %1549 = vsyncpa [#allocation6], 1 }
 0x21d   :  { %1551 = vsyncpa [#allocation6 + $0x1], 1 }
 0x21e   :  { %1552 = vsyncpa [#allocation9], 1 }
 0x21f   :  { %1553 = vsyncpa [#allocation12], 1 }
 0x220   :  { %1554 = vsyncpa [#allocation4], 1 }
 0x221   :  { %1556 = vsyncpa [#allocation4 + $0x1], 1 }
 0x222   :  { %1557 = vsyncpa [#allocation15], 1 }

</bundles_post_ra>
